<compile_context>
chip_gen: v5e
topology: v5e:2x2
jax: 0.10.0
libtpu: 0.0.40
codegen_flags: <defaults>
</compile_context>

<pallas_src>
import jax
import jax.numpy as jnp
from jax.experimental import pallas as pl
from jax.experimental.pallas import tpu as pltpu

BETA = 0.5          # Leaky beta; with zero initial mem, mem_out == cur
THRESHOLD = 1.0     # snn.Leaky default threshold
LANES = 128         # pad all output-channel dims to full lane width
_V7X_SCOPED_VMEM = 32 * 1024 * 1024   # tightest default scoped VMEM (v7x)


def _round_up(x, m):
    return (x + m - 1) // m * m


def _choose_tm(mq, tm_target):
    """M-tile: multiple of 16, derived from the actual row count so padding
    waste is ~16*steps rows instead of up to (tm_target-1) junk rows."""
    mq16 = _round_up(mq, 16)
    if mq16 <= tm_target:
        return mq16
    steps = -(-mq16 // tm_target)            # ceil(mq16 / target)
    return _round_up(-(-mq16 // steps), 16)  # ceil(mq16 / steps) -> mult of 16


# ----------------------------- Pallas kernels -----------------------------

def conv_pool_lif_kernel(a_ref, w_ref, b_ref, spk_ref):
    """Fused im2col-conv + bias + 2x2 maxpool + Leaky fire.

    a_ref:   (4, TM, K) bf16  -- the 4 pool taps of the im2col matrix
    w_ref:   (K, 128)   bf16  -- conv weights, OC zero-padded to 128 lanes
    b_ref:   (1, 128)   f32   -- bias, zero-padded
    spk_ref: (TM, 128)  bf16  -- pooled spikes (lane-dense store)

    Running max over the 4 taps keeps only two live (TM,128) f32 values.
    """
    w = w_ref[...]
    cur = jnp.dot(a_ref[0], w, preferred_element_type=jnp.float32)
    cur = jnp.maximum(cur, jnp.dot(a_ref[1], w, preferred_element_type=jnp.float32))
    cur = jnp.maximum(cur, jnp.dot(a_ref[2], w, preferred_element_type=jnp.float32))
    cur = jnp.maximum(cur, jnp.dot(a_ref[3], w, preferred_element_type=jnp.float32))
    cur = cur + b_ref[...]
    spk_ref[...] = (cur > THRESHOLD).astype(spk_ref.dtype)


def fc_lif_kernel(a_ref, w_ref, b_ref, spk_ref, mem_ref):
    """Fused fully-connected layer + Leaky fire (spk and mem are returned)."""
    cur = (
        jnp.dot(a_ref[...], w_ref[...], preferred_element_type=jnp.float32)
        + b_ref[...]
    )
    mem_ref[...] = cur                                  # mem = beta*0 + cur
    spk_ref[...] = (cur > THRESHOLD).astype(spk_ref.dtype)


# ----------------------------- Pallas wrappers -----------------------------

def conv_pool_lif(a, w2d, bias, *, tm_target):
    """a: (4, Mq, K) bf16; w2d: (K, 128) bf16; bias: (128,) f32 -> (Mq, 128) bf16."""
    _, mq, k = a.shape
    tm = _choose_tm(mq, tm_target)
    mp = _round_up(mq, tm)
    if mp != mq:
        # Padded rows see bias-only currents and may "spike"; they are sliced
        # off below -- keep that slice if this tiling logic ever changes.
        a = jnp.pad(a, ((0, 0), (0, mp - mq), (0, 0)))

    # Double-buffered VMEM budget (inputs + output), checked against the
    # tightest (v7x) scoped default rather than assumed.
    vmem = 2 * (4 * tm * k * 2 + k * LANES * 2 + LANES * 4 + tm * LANES * 2)
    assert vmem < _V7X_SCOPED_VMEM, f"conv_pool_lif tile too large for VMEM ({vmem} B)"

    spk = pl.pallas_call(
        conv_pool_lif_kernel,
        out_shape=jax.ShapeDtypeStruct((mp, LANES), jnp.bfloat16),
        grid_spec=pltpu.PrefetchScalarGridSpec(
            num_scalar_prefetch=0,
            grid=(mp // tm,),
            in_specs=[
                pl.BlockSpec((4, tm, k), lambda m: (0, m, 0)),
                pl.BlockSpec((k, LANES), lambda m: (0, 0)),   # resident weights
                pl.BlockSpec((1, LANES), lambda m: (0, 0)),   # resident bias
            ],
            out_specs=pl.BlockSpec((tm, LANES), lambda m: (m, 0)),
        ),
        compiler_params=pltpu.CompilerParams(
            dimension_semantics=("parallel",)),
    )(a, w2d, bias.reshape(1, LANES))
    return spk[:mq]


def fc_lif(a, w2d, bias, *, tm_target=512):
    """a: (M, K) bf16; w2d: (K, 128) bf16; bias: (128,) f32 -> two (M, 128) f32."""
    m_rows, k = a.shape
    tm = _choose_tm(m_rows, tm_target)
    mp = _round_up(m_rows, tm)
    if mp != m_rows:
        a = jnp.pad(a, ((0, mp - m_rows), (0, 0)))

    vmem = 2 * (tm * k * 2 + k * LANES * 2 + LANES * 4 + 2 * tm * LANES * 4)
    assert vmem < _V7X_SCOPED_VMEM, f"fc_lif tile too large for VMEM ({vmem} B)"

    spk, mem = pl.pallas_call(
        fc_lif_kernel,
        out_shape=(jax.ShapeDtypeStruct((mp, LANES), jnp.float32),
                   jax.ShapeDtypeStruct((mp, LANES), jnp.float32)),
        grid_spec=pltpu.PrefetchScalarGridSpec(
            num_scalar_prefetch=0,
            grid=(mp // tm,),
            in_specs=[
                pl.BlockSpec((tm, k), lambda m: (m, 0)),
                pl.BlockSpec((k, LANES), lambda m: (0, 0)),
                pl.BlockSpec((1, LANES), lambda m: (0, 0)),
            ],
            out_specs=(pl.BlockSpec((tm, LANES), lambda m: (m, 0)),
                       pl.BlockSpec((tm, LANES), lambda m: (m, 0))),
        ),
        compiler_params=pltpu.CompilerParams(
            dimension_semantics=("parallel",)),
    )(a, w2d, bias.reshape(1, LANES))
    return spk[:m_rows], mem[:m_rows]


# ----------------------- trace-time layout / weight prep -----------------------

def im2col_pooled(x, ksize):
    """x: (N, H, W, C) -> (A, (N, PH, PW)).

    A: (4, N*PH*PW, ksize*ksize*C).  Tap t = di*2+dj; row (n, i, j) of tap t is
    the conv patch at output position (2i+di, 2j+dj), columns ordered (kh, kw, c).
    maxpool2x2(conv(x)) == max over the tap axis of (A @ W2d)."""
    n, h, w, c = x.shape
    oh, ow = h - ksize + 1, w - ksize + 1
    ph, pw = oh // 2, ow // 2
    taps = []
    for di in range(2):
        for dj in range(2):
            cols = []
            for kh in range(ksize):
                for kw in range(ksize):
                    r0, c0 = di + kh, dj + kw
                    cols.append(
                        x[:, r0:r0 + 2 * ph - 1:2, c0:c0 + 2 * pw - 1:2, :])
            tap = jnp.stack(cols, axis=3)                     # (N,PH,PW,K*K,C)
            taps.append(tap.reshape(n * ph * pw, ksize * ksize * c))
    return jnp.stack(taps, axis=0), (n, ph, pw)


def conv_weight_2d(w, k_pad=None):
    """(OC, IC, KH, KW) torch layout -> (K[_pad], 128) bf16, OC zero-padded."""
    oc, ic, kh, kw = w.shape
    w2 = jnp.transpose(w, (2, 3, 1, 0)).reshape(kh * kw * ic, oc)
    if k_pad is not None and k_pad > w2.shape[0]:
        w2 = jnp.pad(w2, ((0, k_pad - w2.shape[0]), (0, 0)))
    return jnp.pad(w2, ((0, 0), (0, LANES - oc))).astype(jnp.bfloat16)


def fc_weight_folded(w, ph, pw, c):
    """torch fc weight (O, C*PH*PW) over the NCHW-flattened spk2 (c, i, j) ->
    (PH*PW*128, 128) bf16 over our lane-padded, NHWC-flattened spk2 layout
    (p = i*PW + j major, 128 padded channels minor).  Folds the PyTorch
    `.view(batch, -1)` permutation into the weight — no activation transpose."""
    o = w.shape[0]
    p = ph * pw
    w3 = w.reshape(o, c, p)                      # [o, c, p] = w[o, c*P + p]
    w3 = jnp.transpose(w3, (2, 1, 0))            # (p, c, o)
    w3 = jnp.pad(w3, ((0, 0), (0, LANES - c), (0, LANES - o)))
    return w3.reshape(p * LANES, LANES).astype(jnp.bfloat16)


def pad_bias(b):
    return jnp.pad(b, (0, LANES - b.shape[0])).astype(jnp.float32)


# ----------------------------- forward pass -----------------------------

def net_forward(x_nchw, params):
    n = x_nchw.shape[0]
    # NCHW -> NHWC (C=1, so this is a free relayout) + bf16 activations.
    x = jnp.transpose(x_nchw, (0, 2, 3, 1)).astype(jnp.bfloat16)    # (N,28,28,1)

    # conv1 (1->12, 5x5) + maxpool2 + Leaky, fused in one kernel.
    # Large M-tile (2048): K=25 so the A block is only ~0.4 MB, and at batch
    # 128 the grid drops to ~9 steps -> far less per-step pipeline overhead.
    a1, (_, ph1, pw1) = im2col_pooled(x, 5)                         # (4, N*144, 25)
    spk1 = conv_pool_lif(a1, conv_weight_2d(params["conv1_w"]),
                         pad_bias(params["conv1_b"]), tm_target=2048)

    # conv2 (12->64, 5x5) + maxpool2 + Leaky, fused.
    # M is only N*16, so a smaller tile (512) keeps >=4 grid steps at batch
    # 128 and lets v7x's two TensorCores pipeline instead of 1 step per core.
    # K is zero-padded 300 -> 384 (with matching zero weight rows) so the A
    # loads are unmasked lane-tile aligned and the bf16 weight rows 16-aligned.
    x1 = spk1.reshape(n, ph1, pw1, LANES)[..., :12]                 # drop pad lanes
    a2, (_, ph2, pw2) = im2col_pooled(x1, 5)                        # (4, N*16, 300)
    k2 = _round_up(a2.shape[-1], LANES)                             # 300 -> 384
    a2 = jnp.pad(a2, ((0, 0), (0, 0), (0, k2 - a2.shape[-1])))
    spk2 = conv_pool_lif(a2, conv_weight_2d(params["conv2_w"], k_pad=k2),
                         pad_bias(params["conv2_b"]), tm_target=512)

    # fc1 (64*4*4 -> 10) + Leaky, fused; NCHW flatten folded into the weight.
    flat = spk2.reshape(n, ph2 * pw2 * LANES)                       # free reshape
    wfc = fc_weight_folded(params["fc1_w"], ph2, pw2, 64)
    spk3, mem3 = fc_lif(flat, wfc, pad_bias(params["fc1_b"]))       # (N,128) each

    # mem3 == cur3 is the correct snntorch Leaky single-step membrane: the
    # subtract-reset uses the incoming mem (== init_leaky() == 0), so no reset
    # is applied within this step.
    return spk3[:, :10], mem3[:, :10]


# ----------------------------- params / driver -----------------------------

def init_params(key):
    # PyTorch default init: U(-1/sqrt(fan_in), 1/sqrt(fan_in)) for weight & bias.
    ks = jax.random.split(key, 6)

    def u(k, shape, fan_in):
        bound = 1.0 / jnp.sqrt(jnp.float32(fan_in))
        return jax.random.uniform(k, shape, jnp.float32, -bound, bound)

    return {
        "conv1_w": u(ks[0], (12, 1, 5, 5), 1 * 5 * 5),
        "conv1_b": u(ks[1], (12,), 1 * 5 * 5),
        "conv2_w": u(ks[2], (64, 12, 5, 5), 12 * 5 * 5),
        "conv2_b": u(ks[3], (64,), 12 * 5 * 5),
        "fc1_w":   u(ks[4], (10, 64 * 4 * 4), 64 * 4 * 4),
        "fc1_b":   u(ks[5], (10,), 64 * 4 * 4),
    }


if __name__ == "__main__":
    key = jax.random.PRNGKey(0)
    k_in, k_p = jax.random.split(key)
    params = init_params(k_p)

    batch = 2  # small batch (module's hard-coded 128 only appears in .view)
    # 28x28x1 input is what the layer dims imply (MNIST): 28-5+1=24 ->12 ->8 ->4
    x = jax.random.normal(k_in, (batch, 1, 28, 28), dtype=jnp.float32)

    spk3, mem3 = jax.jit(net_forward)(x, params)
    jax.block_until_ready((spk3, mem3))
    assert spk3.shape == (batch, 10) and mem3.shape == (batch, 10)
    assert spk3.dtype == jnp.float32 and mem3.dtype == jnp.float32
    print("KERNEL_OK")
</pallas_src>

<mosaic_0001>
module attributes {stable_mosaic.version = 11 : i64} {
  func.func @conv_pool_lif_kernel(%arg0: i32, %arg1: memref<4x288x25xbf16, #tpu.memory_space<vmem>>, %arg2: memref<25x128xbf16, #tpu.memory_space<vmem>>, %arg3: memref<1x128xf32, #tpu.memory_space<vmem>>, %arg4: memref<288x128xbf16, #tpu.memory_space<vmem>>) attributes {dimension_semantics = [#tpu.dimension_semantics<parallel>], iteration_bounds = array<i64: 1>, scalar_prefetch = 0 : i64, scratch_operands = 0 : i64, tpu.core_type = #tpu.core_type<tc>, window_params = [{transform_indices = @transform_0, window_bounds = array<i64: 4, 288, 25>}, {pipeline_mode = #tpu.pipeline_mode<synchronous>, transform_indices = @transform_1, window_bounds = array<i64: 25, 128>}, {pipeline_mode = #tpu.pipeline_mode<synchronous>, transform_indices = @transform_2, window_bounds = array<i64: 1, 128>}, {transform_indices = @transform_3, window_bounds = array<i64: 288, 128>}]} {
    %c0 = arith.constant 0 : index
    %c0_0 = arith.constant 0 : index
    %0 = vector.load %arg2[%c0, %c0_0] : memref<25x128xbf16, #tpu.memory_space<vmem>>, vector<25x128xbf16>
    %c0_1 = arith.constant 0 : index
    %c0_2 = arith.constant 0 : index
    %c0_3 = arith.constant 0 : index
    %1 = vector.load %arg1[%c0_1, %c0_2, %c0_3] : memref<4x288x25xbf16, #tpu.memory_space<vmem>>, vector<1x288x25xbf16>
    %2 = vector.shape_cast %1 : vector<1x288x25xbf16> to vector<288x25xbf16>
    %cst = arith.constant dense<0.000000e+00> : vector<288x128xf32>
    %3 = tpu.matmul %2, %0, %cst {dimension_numbers = #tpu.dot_dimension_numbers<[1], [0], [0], [1], [0, 0, 1, 1], [], []>} : vector<288x25xbf16>, vector<25x128xbf16>, vector<288x128xf32> -> vector<288x128xf32>
    %c1 = arith.constant 1 : index
    %c0_4 = arith.constant 0 : index
    %c0_5 = arith.constant 0 : index
    %4 = vector.load %arg1[%c1, %c0_4, %c0_5] : memref<4x288x25xbf16, #tpu.memory_space<vmem>>, vector<1x288x25xbf16>
    %5 = vector.shape_cast %4 : vector<1x288x25xbf16> to vector<288x25xbf16>
    %cst_6 = arith.constant dense<0.000000e+00> : vector<288x128xf32>
    %6 = tpu.matmul %5, %0, %cst_6 {dimension_numbers = #tpu.dot_dimension_numbers<[1], [0], [0], [1], [0, 0, 1, 1], [], []>} : vector<288x25xbf16>, vector<25x128xbf16>, vector<288x128xf32> -> vector<288x128xf32>
    %7 = arith.maximumf %3, %6 : vector<288x128xf32>
    %c2 = arith.constant 2 : index
    %c0_7 = arith.constant 0 : index
    %c0_8 = arith.constant 0 : index
    %8 = vector.load %arg1[%c2, %c0_7, %c0_8] : memref<4x288x25xbf16, #tpu.memory_space<vmem>>, vector<1x288x25xbf16>
    %9 = vector.shape_cast %8 : vector<1x288x25xbf16> to vector<288x25xbf16>
    %cst_9 = arith.constant dense<0.000000e+00> : vector<288x128xf32>
    %10 = tpu.matmul %9, %0, %cst_9 {dimension_numbers = #tpu.dot_dimension_numbers<[1], [0], [0], [1], [0, 0, 1, 1], [], []>} : vector<288x25xbf16>, vector<25x128xbf16>, vector<288x128xf32> -> vector<288x128xf32>
    %11 = arith.maximumf %7, %10 : vector<288x128xf32>
    %c3 = arith.constant 3 : index
    %c0_10 = arith.constant 0 : index
    %c0_11 = arith.constant 0 : index
    %12 = vector.load %arg1[%c3, %c0_10, %c0_11] : memref<4x288x25xbf16, #tpu.memory_space<vmem>>, vector<1x288x25xbf16>
    %13 = vector.shape_cast %12 : vector<1x288x25xbf16> to vector<288x25xbf16>
    %cst_12 = arith.constant dense<0.000000e+00> : vector<288x128xf32>
    %14 = tpu.matmul %13, %0, %cst_12 {dimension_numbers = #tpu.dot_dimension_numbers<[1], [0], [0], [1], [0, 0, 1, 1], [], []>} : vector<288x25xbf16>, vector<25x128xbf16>, vector<288x128xf32> -> vector<288x128xf32>
    %15 = arith.maximumf %11, %14 : vector<288x128xf32>
    %c0_13 = arith.constant 0 : index
    %c0_14 = arith.constant 0 : index
    %16 = vector.load %arg3[%c0_13, %c0_14] : memref<1x128xf32, #tpu.memory_space<vmem>>, vector<1x128xf32>
    %17 = vector.broadcast %16 : vector<1x128xf32> to vector<288x128xf32>
    %18 = arith.addf %15, %17 : vector<288x128xf32>
    %cst_15 = arith.constant 1.000000e+00 : f32
    %19 = vector.broadcast %cst_15 : f32 to vector<288x128xf32>
    %20 = arith.cmpf ogt, %18, %19 : vector<288x128xf32>
    %21 = arith.extui %20 : vector<288x128xi1> to vector<288x128xi32>
    %22 = arith.sitofp %21 : vector<288x128xi32> to vector<288x128xf32>
    %23 = arith.truncf %22 : vector<288x128xf32> to vector<288x128xbf16>
    %c0_16 = arith.constant 0 : index
    %c0_17 = arith.constant 0 : index
    %24 = vector.load %arg4[%c0_16, %c0_17] : memref<288x128xbf16, #tpu.memory_space<vmem>>, vector<288x128xbf16>
    tpu.vector_store %arg4[%c0_16, %c0_17], %23 {strides = array<i32>} : memref<288x128xbf16, #tpu.memory_space<vmem>>, vector<288x128xbf16>,
    return
  }
  func.func @transform_0(%arg0: i32) -> (i32, i32, i32) {
    %c0_i32 = arith.constant 0 : i32
    %c0_i32_0 = arith.constant 0 : i32
    %c0_i32_1 = arith.constant 0 : i32
    return %c0_i32, %arg0, %c0_i32_0 : i32, i32, i32
  }
  func.func @transform_1(%arg0: i32) -> (i32, i32) {
    %c0_i32 = arith.constant 0 : i32
    %c0_i32_0 = arith.constant 0 : i32
    %c0_i32_1 = arith.constant 0 : i32
    return %c0_i32, %c0_i32_0 : i32, i32
  }
  func.func @transform_2(%arg0: i32) -> (i32, i32) {
    %c0_i32 = arith.constant 0 : i32
    %c0_i32_0 = arith.constant 0 : i32
    %c0_i32_1 = arith.constant 0 : i32
    return %c0_i32, %c0_i32_0 : i32, i32
  }
  func.func @transform_3(%arg0: i32) -> (i32, i32) {
    %c0_i32 = arith.constant 0 : i32
    %c0_i32_0 = arith.constant 0 : i32
    return %arg0, %c0_i32 : i32, i32
  }
}

module attributes {stable_mosaic.version = 11 : i64} {
  func.func @conv_pool_lif_kernel(%arg0: i32, %arg1: memref<4x32x384xbf16, #tpu.memory_space<vmem>>, %arg2: memref<384x128xbf16, #tpu.memory_space<vmem>>, %arg3: memref<1x128xf32, #tpu.memory_space<vmem>>, %arg4: memref<32x128xbf16, #tpu.memory_space<vmem>>) attributes {dimension_semantics = [#tpu.dimension_semantics<parallel>], iteration_bounds = array<i64: 1>, scalar_prefetch = 0 : i64, scratch_operands = 0 : i64, tpu.core_type = #tpu.core_type<tc>, window_params = [{transform_indices = @transform_0, window_bounds = array<i64: 4, 32, 384>}, {pipeline_mode = #tpu.pipeline_mode<synchronous>, transform_indices = @transform_1, window_bounds = array<i64: 384, 128>}, {pipeline_mode = #tpu.pipeline_mode<synchronous>, transform_indices = @transform_2, window_bounds = array<i64: 1, 128>}, {transform_indices = @transform_3, window_bounds = array<i64: 32, 128>}]} {
    %c0 = arith.constant 0 : index
    %c0_0 = arith.constant 0 : index
    %0 = vector.load %arg2[%c0, %c0_0] : memref<384x128xbf16, #tpu.memory_space<vmem>>, vector<384x128xbf16>
    %c0_1 = arith.constant 0 : index
    %c0_2 = arith.constant 0 : index
    %c0_3 = arith.constant 0 : index
    %1 = vector.load %arg1[%c0_1, %c0_2, %c0_3] : memref<4x32x384xbf16, #tpu.memory_space<vmem>>, vector<1x32x384xbf16>
    %2 = vector.shape_cast %1 : vector<1x32x384xbf16> to vector<32x384xbf16>
    %cst = arith.constant dense<0.000000e+00> : vector<32x128xf32>
    %3 = tpu.matmul %2, %0, %cst {dimension_numbers = #tpu.dot_dimension_numbers<[1], [0], [0], [1], [0, 0, 1, 1], [], []>} : vector<32x384xbf16>, vector<384x128xbf16>, vector<32x128xf32> -> vector<32x128xf32>
    %c1 = arith.constant 1 : index
    %c0_4 = arith.constant 0 : index
    %c0_5 = arith.constant 0 : index
    %4 = vector.load %arg1[%c1, %c0_4, %c0_5] : memref<4x32x384xbf16, #tpu.memory_space<vmem>>, vector<1x32x384xbf16>
    %5 = vector.shape_cast %4 : vector<1x32x384xbf16> to vector<32x384xbf16>
    %cst_6 = arith.constant dense<0.000000e+00> : vector<32x128xf32>
    %6 = tpu.matmul %5, %0, %cst_6 {dimension_numbers = #tpu.dot_dimension_numbers<[1], [0], [0], [1], [0, 0, 1, 1], [], []>} : vector<32x384xbf16>, vector<384x128xbf16>, vector<32x128xf32> -> vector<32x128xf32>
    %7 = arith.maximumf %3, %6 : vector<32x128xf32>
    %c2 = arith.constant 2 : index
    %c0_7 = arith.constant 0 : index
    %c0_8 = arith.constant 0 : index
    %8 = vector.load %arg1[%c2, %c0_7, %c0_8] : memref<4x32x384xbf16, #tpu.memory_space<vmem>>, vector<1x32x384xbf16>
    %9 = vector.shape_cast %8 : vector<1x32x384xbf16> to vector<32x384xbf16>
    %cst_9 = arith.constant dense<0.000000e+00> : vector<32x128xf32>
    %10 = tpu.matmul %9, %0, %cst_9 {dimension_numbers = #tpu.dot_dimension_numbers<[1], [0], [0], [1], [0, 0, 1, 1], [], []>} : vector<32x384xbf16>, vector<384x128xbf16>, vector<32x128xf32> -> vector<32x128xf32>
    %11 = arith.maximumf %7, %10 : vector<32x128xf32>
    %c3 = arith.constant 3 : index
    %c0_10 = arith.constant 0 : index
    %c0_11 = arith.constant 0 : index
    %12 = vector.load %arg1[%c3, %c0_10, %c0_11] : memref<4x32x384xbf16, #tpu.memory_space<vmem>>, vector<1x32x384xbf16>
    %13 = vector.shape_cast %12 : vector<1x32x384xbf16> to vector<32x384xbf16>
    %cst_12 = arith.constant dense<0.000000e+00> : vector<32x128xf32>
    %14 = tpu.matmul %13, %0, %cst_12 {dimension_numbers = #tpu.dot_dimension_numbers<[1], [0], [0], [1], [0, 0, 1, 1], [], []>} : vector<32x384xbf16>, vector<384x128xbf16>, vector<32x128xf32> -> vector<32x128xf32>
    %15 = arith.maximumf %11, %14 : vector<32x128xf32>
    %c0_13 = arith.constant 0 : index
    %c0_14 = arith.constant 0 : index
    %16 = vector.load %arg3[%c0_13, %c0_14] : memref<1x128xf32, #tpu.memory_space<vmem>>, vector<1x128xf32>
    %17 = vector.broadcast %16 : vector<1x128xf32> to vector<32x128xf32>
    %18 = arith.addf %15, %17 : vector<32x128xf32>
    %cst_15 = arith.constant 1.000000e+00 : f32
    %19 = vector.broadcast %cst_15 : f32 to vector<32x128xf32>
    %20 = arith.cmpf ogt, %18, %19 : vector<32x128xf32>
    %21 = arith.extui %20 : vector<32x128xi1> to vector<32x128xi32>
    %22 = arith.sitofp %21 : vector<32x128xi32> to vector<32x128xf32>
    %23 = arith.truncf %22 : vector<32x128xf32> to vector<32x128xbf16>
    %c0_16 = arith.constant 0 : index
    %c0_17 = arith.constant 0 : index
    %24 = vector.load %arg4[%c0_16, %c0_17] : memref<32x128xbf16, #tpu.memory_space<vmem>>, vector<32x128xbf16>
    tpu.vector_store %arg4[%c0_16, %c0_17], %23 {strides = array<i32>} : memref<32x128xbf16, #tpu.memory_space<vmem>>, vector<32x128xbf16>,
    return
  }
  func.func @transform_0(%arg0: i32) -> (i32, i32, i32) {
    %c0_i32 = arith.constant 0 : i32
    %c0_i32_0 = arith.constant 0 : i32
    %c0_i32_1 = arith.constant 0 : i32
    return %c0_i32, %arg0, %c0_i32_0 : i32, i32, i32
  }
  func.func @transform_1(%arg0: i32) -> (i32, i32) {
    %c0_i32 = arith.constant 0 : i32
    %c0_i32_0 = arith.constant 0 : i32
    %c0_i32_1 = arith.constant 0 : i32
    return %c0_i32, %c0_i32_0 : i32, i32
  }
  func.func @transform_2(%arg0: i32) -> (i32, i32) {
    %c0_i32 = arith.constant 0 : i32
    %c0_i32_0 = arith.constant 0 : i32
    %c0_i32_1 = arith.constant 0 : i32
    return %c0_i32, %c0_i32_0 : i32, i32
  }
  func.func @transform_3(%arg0: i32) -> (i32, i32) {
    %c0_i32 = arith.constant 0 : i32
    %c0_i32_0 = arith.constant 0 : i32
    return %arg0, %c0_i32 : i32, i32
  }
}

module attributes {stable_mosaic.version = 11 : i64} {
  func.func @fc_lif_kernel(%arg0: i32, %arg1: memref<16x2048xbf16, #tpu.memory_space<vmem>>, %arg2: memref<2048x128xbf16, #tpu.memory_space<vmem>>, %arg3: memref<1x128xf32, #tpu.memory_space<vmem>>, %arg4: memref<16x128xf32, #tpu.memory_space<vmem>>, %arg5: memref<16x128xf32, #tpu.memory_space<vmem>>) attributes {dimension_semantics = [#tpu.dimension_semantics<parallel>], iteration_bounds = array<i64: 1>, scalar_prefetch = 0 : i64, scratch_operands = 0 : i64, tpu.core_type = #tpu.core_type<tc>, window_params = [{transform_indices = @transform_0, window_bounds = array<i64: 16, 2048>}, {pipeline_mode = #tpu.pipeline_mode<synchronous>, transform_indices = @transform_1, window_bounds = array<i64: 2048, 128>}, {pipeline_mode = #tpu.pipeline_mode<synchronous>, transform_indices = @transform_2, window_bounds = array<i64: 1, 128>}, {transform_indices = @transform_3, window_bounds = array<i64: 16, 128>}, {transform_indices = @transform_4, window_bounds = array<i64: 16, 128>}]} {
    %c0 = arith.constant 0 : index
    %c0_0 = arith.constant 0 : index
    %0 = vector.load %arg1[%c0, %c0_0] : memref<16x2048xbf16, #tpu.memory_space<vmem>>, vector<16x2048xbf16>
    %c0_1 = arith.constant 0 : index
    %c0_2 = arith.constant 0 : index
    %1 = vector.load %arg2[%c0_1, %c0_2] : memref<2048x128xbf16, #tpu.memory_space<vmem>>, vector<2048x128xbf16>
    %cst = arith.constant dense<0.000000e+00> : vector<16x128xf32>
    %2 = tpu.matmul %0, %1, %cst {dimension_numbers = #tpu.dot_dimension_numbers<[1], [0], [0], [1], [0, 0, 1, 1], [], []>} : vector<16x2048xbf16>, vector<2048x128xbf16>, vector<16x128xf32> -> vector<16x128xf32>
    %c0_3 = arith.constant 0 : index
    %c0_4 = arith.constant 0 : index
    %3 = vector.load %arg3[%c0_3, %c0_4] : memref<1x128xf32, #tpu.memory_space<vmem>>, vector<1x128xf32>
    %4 = vector.broadcast %3 : vector<1x128xf32> to vector<16x128xf32>
    %5 = arith.addf %2, %4 : vector<16x128xf32>
    %c0_5 = arith.constant 0 : index
    %c0_6 = arith.constant 0 : index
    %6 = vector.load %arg5[%c0_5, %c0_6] : memref<16x128xf32, #tpu.memory_space<vmem>>, vector<16x128xf32>
    tpu.vector_store %arg5[%c0_5, %c0_6], %5 {strides = array<i32>} : memref<16x128xf32, #tpu.memory_space<vmem>>, vector<16x128xf32>,
    %cst_7 = arith.constant 1.000000e+00 : f32
    %7 = vector.broadcast %cst_7 : f32 to vector<16x128xf32>
    %8 = arith.cmpf ogt, %5, %7 : vector<16x128xf32>
    %9 = arith.extui %8 : vector<16x128xi1> to vector<16x128xi32>
    %10 = arith.sitofp %9 : vector<16x128xi32> to vector<16x128xf32>
    %c0_8 = arith.constant 0 : index
    %c0_9 = arith.constant 0 : index
    %11 = vector.load %arg4[%c0_8, %c0_9] : memref<16x128xf32, #tpu.memory_space<vmem>>, vector<16x128xf32>
    tpu.vector_store %arg4[%c0_8, %c0_9], %10 {strides = array<i32>} : memref<16x128xf32, #tpu.memory_space<vmem>>, vector<16x128xf32>,
    return
  }
  func.func @transform_0(%arg0: i32) -> (i32, i32) {
    %c0_i32 = arith.constant 0 : i32
    %c0_i32_0 = arith.constant 0 : i32
    return %arg0, %c0_i32 : i32, i32
  }
  func.func @transform_1(%arg0: i32) -> (i32, i32) {
    %c0_i32 = arith.constant 0 : i32
    %c0_i32_0 = arith.constant 0 : i32
    %c0_i32_1 = arith.constant 0 : i32
    return %c0_i32, %c0_i32_0 : i32, i32
  }
  func.func @transform_2(%arg0: i32) -> (i32, i32) {
    %c0_i32 = arith.constant 0 : i32
    %c0_i32_0 = arith.constant 0 : i32
    %c0_i32_1 = arith.constant 0 : i32
    return %c0_i32, %c0_i32_0 : i32, i32
  }
  func.func @transform_3(%arg0: i32) -> (i32, i32) {
    %c0_i32 = arith.constant 0 : i32
    %c0_i32_0 = arith.constant 0 : i32
    return %arg0, %c0_i32 : i32, i32
  }
  func.func @transform_4(%arg0: i32) -> (i32, i32) {
    %c0_i32 = arith.constant 0 : i32
    %c0_i32_0 = arith.constant 0 : i32
    return %arg0, %c0_i32 : i32, i32
  }
}

</mosaic_0001>

<bundles_post_ra>
// kernel: net_forward.3
= control target key start
LH: loop header
LB: loop body
LE: loop exit
PB: predicated region body
PF: predicated region fallthrough
CT: control target
= control target key end

     0   :  { %vm211_vm0 = vcmask 1043456   ;;  %vm212_vm1 = vcmask 1044480   ;;  %v2149_v2 = vmov 65535   ;;  %vm156_vm2 = vcmask 203776   ;;  %s2599_s1 = inlined_call_operand.vmem [shape: bf16[25,128], index: 1, kind: input, shape index: {}]   ;;  %s2600_s0 = inlined_call_operand.vmem [shape: bf16[4,288,25], index: 0, kind: input, shape index: {}]   ;;  %s2601_s2 = inlined_call_operand.vmem [shape: f32[1,128], index: 2, kind: input, shape index: {}]   ;;  %s2602_s3 = inlined_call_operand.vmem [shape: bf16[288,128], index: 3, kind: output, shape index: {}]  }
   0x1   :  { %v1567_v0 = vld [vmem:[%s2599_s1 + $0x8] sm:$0xf]  ;;  %v2002_v1 = vld [vmem:[%s2599_s1 + $0x8] sm:$0x10]  ;;  %v213_v3 = vsel %vm211_vm0, 4294967295, %v2149_v2  ;;  %v2001_v7 = vld [vmem:[%s2599_s1] sm:$0xff] }
   0x2   :  { %v1568_v4 = vor.u32 %v2002_v1, %v1567_v0  ;;  %v214_v5 = vsel %vm212_vm1, %v213_v3, 0  ;;  %v2003_v8 = vld [vmem:[%s2600_s0] sm:$0xff]  ;;  %v2021_v9 = vld [vmem:[%s2600_s0 + $0x90] sm:$0xff]  ;;  %v2004_v12 = vld [vmem:[%s2600_s0 + $0x8] sm:$0xff] }
   0x3   :  { %v2039_v10 = vld [vmem:[%s2600_s0 + $0x120] sm:$0xff]  ;;  %v2057_v11 = vld [vmem:[%s2600_s0 + $0x1b0] sm:$0xff]  ;;  %v2022_v13 = vld [vmem:[%s2600_s0 + $0x98] sm:$0xff] }
   0x4   :  { %v216_v6 = vand.u32 %v1568_v4, %v214_v5  ;;  %v2040_v14 = vld [vmem:[%s2600_s0 + $0x128] sm:$0xff]  ;;  %v2058_v15 = vld [vmem:[%s2600_s0 + $0x1b8] sm:$0xff]  ;;  %v2005_v16 = vld [vmem:[%s2600_s0 + $0x10] sm:$0xff]  ;;  %v2150_v4 = vmov 0.0  }
   0x5   :  { %v2023_v17 = vld [vmem:[%s2600_s0 + $0xa0] sm:$0xff]  ;;  %v2041_v18 = vld [vmem:[%s2600_s0 + $0x130] sm:$0xff]  ;;  %v2006_v20 = vld [vmem:[%s2600_s0 + $0x18] sm:$0xff] }
   0x6   :  { %224 = vmatpush.bf16.msra.mxu0 %v216_v6  ;;  %504 = vmatpush.bf16.msra.mxu1 %v216_v6  ;;  %v2059_v19 = vld [vmem:[%s2600_s0 + $0x1c0] sm:$0xff]  ;;  %v2024_v21 = vld [vmem:[%s2600_s0 + $0xa8] sm:$0xff]  ;;  %v2042_v22 = vld [vmem:[%s2600_s0 + $0x138] sm:$0xff] }
   0x7   :  { %820 = vmatpush.bf16.msra.mxu2 %v216_v6  ;;  %1136 = vmatpush.bf16.msra.mxu3 %v216_v6  ;;  %v2060_v23 = vld [vmem:[%s2600_s0 + $0x1c8] sm:$0xff]  ;;  %v2007_v24 = vld [vmem:[%s2600_s0 + $0x20] sm:$0xff]  ;;  %v2025_v25 = vld [vmem:[%s2600_s0 + $0xb0] sm:$0xff] }
   0x8   :  { %v2043_v26 = vld [vmem:[%s2600_s0 + $0x140] sm:$0xff]  ;;  %v2061_v27 = vld [vmem:[%s2600_s0 + $0x1d0] sm:$0xff]  ;;  %v2008_v28 = vld [vmem:[%s2600_s0 + $0x28] sm:$0xff] }
   0x9   :  { %v2026_v29 = vld [vmem:[%s2600_s0 + $0xb8] sm:$0xff]  ;;  %v2044_v30 = vld [vmem:[%s2600_s0 + $0x148] sm:$0xff]  ;;  %v2009_v32 = vld [vmem:[%s2600_s0 + $0x30] sm:$0xff] }
   0xa   :  { %225 = vmatpush.bf16.msra.mxu0 %v2001_v7  ;;  %505 = vmatpush.bf16.msra.mxu1 %v2001_v7  ;;  %v2062_v31 = vld [vmem:[%s2600_s0 + $0x1d8] sm:$0xff]  ;;  %v2027_v33 = vld [vmem:[%s2600_s0 + $0xc0] sm:$0xff]  ;;  %v2045_v34 = vld [vmem:[%s2600_s0 + $0x150] sm:$0xff] }
   0xb   :  { %821 = vmatpush.bf16.msra.mxu2 %v2001_v7  ;;  %1137 = vmatpush.bf16.msra.mxu3 %v2001_v7  ;;  %v2063_v35 = vld [vmem:[%s2600_s0 + $0x1e0] sm:$0xff]  ;;  %v2010_v36 = vld [vmem:[%s2600_s0 + $0x38] sm:$0xff]  ;;  %v2028_v37 = vld [vmem:[%s2600_s0 + $0xc8] sm:$0xff] }
   0xc   :  { %v2046_v38 = vld [vmem:[%s2600_s0 + $0x158] sm:$0xff]  ;;  %v2064_v39 = vld [vmem:[%s2600_s0 + $0x1e8] sm:$0xff]  ;;  %v2011_v40 = vld [vmem:[%s2600_s0 + $0x40] sm:$0xff] }
   0xd   :  { %1569 = vmatmul.msk.bf16.vlgmr.msra.gmra.mxu0 %vm156_vm2, %v2003_v8  ;;  %1695 = vmatmul.msk.bf16.vlgmr.msra.gmra.mxu1 %vm156_vm2, %v2021_v9  ;;  %v2029_v41 = vld [vmem:[%s2600_s0 + $0xd0] sm:$0xff]  ;;  %v2047_v44 = vld [vmem:[%s2600_s0 + $0x160] sm:$0xff]  ;;  %v2012_v57 = vld [vmem:[%s2600_s0 + $0x48] sm:$0xff] }
   0xe   :  { %1821 = vmatmul.msk.bf16.vlgmr.msra.gmra.mxu2 %vm156_vm2, %v2039_v10  ;;  %1947 = vmatmul.msk.bf16.vlgmr.msra.gmra.mxu3 %vm156_vm2, %v2057_v11  ;;  %v2065_v45 = vld [vmem:[%s2600_s0 + $0x1f0] sm:$0xff]  ;;  %v2327_v53 = vld [vmem:[%s2601_s2] ss:$0 sm:$0xff]  ;;  %v2030_v58 = vld [vmem:[%s2600_s0 + $0xd8] sm:$0xff] }
   0xf   :  { %v2048_v63 = vld [vmem:[%s2600_s0 + $0x168] sm:$0xff]  ;;  %v2066_v0 = vld [vmem:[%s2600_s0 + $0x1f8] sm:$0xff] }
  0x1d   :  { %1570 = vmatmul.msk.bf16.gmra.mxu0 %vm156_vm2, %v2004_v12  ;;  %1696 = vmatmul.msk.bf16.gmra.mxu1 %vm156_vm2, %v2022_v13 }
  0x1e   :  { %1822 = vmatmul.msk.bf16.gmra.mxu2 %vm156_vm2, %v2040_v14  ;;  %1948 = vmatmul.msk.bf16.gmra.mxu3 %vm156_vm2, %v2058_v15 }
  0x2d   :  { %1571 = vmatmul.msk.bf16.gmra.mxu0 %vm156_vm2, %v2005_v16  ;;  %1697 = vmatmul.msk.bf16.gmra.mxu1 %vm156_vm2, %v2023_v17  ;;  %v2013_v17 = vld [vmem:[%s2600_s0 + $0x50] sm:$0xff] }
  0x2e   :  { %1823 = vmatmul.msk.bf16.gmra.mxu2 %vm156_vm2, %v2041_v18  ;;  %1949 = vmatmul.msk.bf16.gmra.mxu3 %vm156_vm2, %v2059_v19  ;;  %v2031_v18 = vld [vmem:[%s2600_s0 + $0xe0] sm:$0xff] }
  0x3d   :  { %1572 = vmatmul.msk.bf16.gmra.mxu0 %vm156_vm2, %v2006_v20  ;;  %1698 = vmatmul.msk.bf16.gmra.mxu1 %vm156_vm2, %v2024_v21 }
  0x3e   :  { %1824 = vmatmul.msk.bf16.gmra.mxu2 %vm156_vm2, %v2042_v22  ;;  %1950 = vmatmul.msk.bf16.gmra.mxu3 %vm156_vm2, %v2060_v23  ;;  %v2049_v23 = vld [vmem:[%s2600_s0 + $0x170] sm:$0xff] }
  0x4d   :  { %1573 = vmatmul.msk.bf16.gmra.mxu0 %vm156_vm2, %v2007_v24  ;;  %1699 = vmatmul.msk.bf16.gmra.mxu1 %vm156_vm2, %v2025_v25  ;;  %v2067_v24 = vld [vmem:[%s2600_s0 + $0x200] sm:$0xff] }
  0x4e   :  { %1825 = vmatmul.msk.bf16.gmra.mxu2 %vm156_vm2, %v2043_v26  ;;  %1951 = vmatmul.msk.bf16.gmra.mxu3 %vm156_vm2, %v2061_v27 }
  0x5d   :  { %1574 = vmatmul.msk.bf16.gmra.mxu0 %vm156_vm2, %v2008_v28  ;;  %1700 = vmatmul.msk.bf16.gmra.mxu1 %vm156_vm2, %v2026_v29 }
  0x5e   :  { %1826 = vmatmul.msk.bf16.gmra.mxu2 %vm156_vm2, %v2044_v30  ;;  %1952 = vmatmul.msk.bf16.gmra.mxu3 %vm156_vm2, %v2062_v31 }
  0x6d   :  { %1575 = vmatmul.msk.bf16.gmra.mxu0 %vm156_vm2, %v2009_v32  ;;  %1701 = vmatmul.msk.bf16.gmra.mxu1 %vm156_vm2, %v2027_v33 }
  0x6e   :  { %1827 = vmatmul.msk.bf16.gmra.mxu2 %vm156_vm2, %v2045_v34  ;;  %1953 = vmatmul.msk.bf16.gmra.mxu3 %vm156_vm2, %v2063_v35 }
  0x7d   :  { %1576 = vmatmul.msk.bf16.gmra.mxu0 %vm156_vm2, %v2010_v36  ;;  %1702 = vmatmul.msk.bf16.gmra.mxu1 %vm156_vm2, %v2028_v37 }
  0x7e   :  { %1828 = vmatmul.msk.bf16.gmra.mxu2 %vm156_vm2, %v2046_v38  ;;  %1954 = vmatmul.msk.bf16.gmra.mxu3 %vm156_vm2, %v2064_v39 }
  0x8a   :  { %v227_v42 = vpop.f32.mrf.mxu0  ;;  %v507_v43 = vpop.f32.mrf.mxu1 }
  0x8b   :  { %v597_v46 = vmax.f32 %v227_v42, %v507_v43 }
  0x8d   :  { %1577 = vmatmul.msk.bf16.gmra.mxu0 %vm156_vm2, %v2011_v40  ;;  %1703 = vmatmul.msk.bf16.gmra.mxu1 %vm156_vm2, %v2029_v41  ;;  %v2014_v40 = vld [vmem:[%s2600_s0 + $0x58] sm:$0xff]  ;;  %v2032_v41 = vld [vmem:[%s2600_s0 + $0xe8] sm:$0xff] }
  0x8e   :  { %1829 = vmatmul.msk.bf16.gmra.mxu2 %vm156_vm2, %v2047_v44  ;;  %1955 = vmatmul.msk.bf16.gmra.mxu3 %vm156_vm2, %v2065_v45 }
  0x91   :  { %v823_v47 = vpop.f32.mrf.mxu2  ;;  %v1139_v48 = vpop.f32.mrf.mxu3 }
  0x92   :  { %v913_v49 = vmax.f32 %v597_v46, %v823_v47  ;;  %v229_v50 = vpop.f32.mrf.mxu0  ;;  %v509_v51 = vpop.f32.mrf.mxu1  ;;  %v2050_v46 = vld [vmem:[%s2600_s0 + $0x178] sm:$0xff]  ;;  %v2068_v47 = vld [vmem:[%s2600_s0 + $0x208] sm:$0xff] }
  0x93   :  { %v598_v54 = vmax.f32 %v229_v50, %v509_v51 }
  0x94   :  { %v1229_v52 = vmax.f32 %v913_v49, %v1139_v48 }
  0x96   :  { %v1269_v59 = vadd.f32 %v2327_v53, %v1229_v52 }
  0x98   :  { %vm1305_vm3 = vcmp.gt.f32.partialorder %v1269_v59, 1.0 }
  0x99   :  { %v825_v55 = vpop.f32.mrf.mxu2  ;;  %v1141_v56 = vpop.f32.mrf.mxu3  ;;  %v1965_v5 = vsel %vm1305_vm3, 1.0, %v2150_v4 }
  0x9a   :  { %v914_v60 = vmax.f32 %v598_v54, %v825_v55  ;;  %v232_v61 = vpop.f32.mrf.mxu0  ;;  %v512_v62 = vpop.f32.mrf.mxu1 }
  0x9b   :  { %v599_v3 = vmax.f32 %v232_v61, %v512_v62 }
  0x9c   :  { %v1230_v1 = vmax.f32 %v914_v60, %v1141_v56 }
  0x9d   :  { %1578 = vmatmul.msk.bf16.gmra.mxu0 %vm156_vm2, %v2012_v57  ;;  %1704 = vmatmul.msk.bf16.gmra.mxu1 %vm156_vm2, %v2030_v58 }
  0x9e   :  { %v1270_v2 = vadd.f32 %v2327_v53, %v1230_v1  ;;  %1830 = vmatmul.msk.bf16.gmra.mxu2 %vm156_vm2, %v2048_v63  ;;  %1956 = vmatmul.msk.bf16.gmra.mxu3 %vm156_vm2, %v2066_v0  ;;  %v2015_v0 = vld [vmem:[%s2600_s0 + $0x60] sm:$0xff]  ;;  %v2033_v1 = vld [vmem:[%s2600_s0 + $0xf0] sm:$0xff] }
  0xa0   :  { %vm1306_vm4 = vcmp.gt.f32.partialorder %v1270_v2, 1.0 }
  0xa1   :  { %v1966_v6 = vsel %vm1306_vm4, 1.0, %v2150_v4  ;;  %v828_v7 = vpop.f32.mrf.mxu2  ;;  %v1144_v8 = vpop.f32.mrf.mxu3 }
  0xa2   :  { %v2076_v9 = vpack.c.bf16 %v1966_v6, %v1965_v5  ;;  %v915_v10 = vmax.f32 %v599_v3, %v828_v7  ;;  %v234_v11 = vpop.f32.mrf.mxu0  ;;  %v514_v12 = vpop.f32.mrf.mxu1  ;;  %v2051_v7 = vld [vmem:[%s2600_s0 + $0x180] sm:$0xff] }
  0xa3   :  { %v600_v14 = vmax.f32 %v234_v11, %v514_v12 }
  0xa4   :  { %2077 = vst [vmem:[%s2602_s3] sm:$0xff] %v2076_v9   ;;  %v1231_v13 = vmax.f32 %v915_v10, %v1144_v8  ;;  %v2069_v8 = vld [vmem:[%s2600_s0 + $0x210] sm:$0xff] }
  0xa6   :  { %v1271_v19 = vadd.f32 %v2327_v53, %v1231_v13 }
  0xa8   :  { %vm1307_vm5 = vcmp.gt.f32.partialorder %v1271_v19, 1.0 }
  0xa9   :  { %v830_v15 = vpop.f32.mrf.mxu2  ;;  %v1146_v16 = vpop.f32.mrf.mxu3  ;;  %v1967_v28 = vsel %vm1307_vm5, 1.0, %v2150_v4 }
  0xaa   :  { %v916_v20 = vmax.f32 %v600_v14, %v830_v15  ;;  %v237_v21 = vpop.f32.mrf.mxu0  ;;  %v517_v22 = vpop.f32.mrf.mxu1 }
  0xab   :  { %v601_v27 = vmax.f32 %v237_v21, %v517_v22 }
  0xac   :  { %v1232_v25 = vmax.f32 %v916_v20, %v1146_v16 }
  0xad   :  { %1579 = vmatmul.msk.bf16.gmra.mxu0 %vm156_vm2, %v2013_v17  ;;  %1705 = vmatmul.msk.bf16.gmra.mxu1 %vm156_vm2, %v2031_v18 }
  0xae   :  { %v1272_v26 = vadd.f32 %v2327_v53, %v1232_v25  ;;  %1831 = vmatmul.msk.bf16.gmra.mxu2 %vm156_vm2, %v2049_v23  ;;  %1957 = vmatmul.msk.bf16.gmra.mxu3 %vm156_vm2, %v2067_v24  ;;  %v2016_v24 = vld [vmem:[%s2600_s0 + $0x68] sm:$0xff]  ;;  %v2034_v25 = vld [vmem:[%s2600_s0 + $0xf8] sm:$0xff] }
  0xb0   :  { %vm1308_vm6 = vcmp.gt.f32.partialorder %v1272_v26, 1.0 }
  0xb1   :  { %v1968_v29 = vsel %vm1308_vm6, 1.0, %v2150_v4  ;;  %v833_v30 = vpop.f32.mrf.mxu2  ;;  %v1149_v31 = vpop.f32.mrf.mxu3 }
  0xb2   :  { %v2079_v32 = vpack.c.bf16 %v1968_v29, %v1967_v28  ;;  %v917_v33 = vmax.f32 %v601_v27, %v833_v30  ;;  %v239_v34 = vpop.f32.mrf.mxu0  ;;  %v519_v35 = vpop.f32.mrf.mxu1  ;;  %v2052_v30 = vld [vmem:[%s2600_s0 + $0x188] sm:$0xff] }
  0xb3   :  { %v602_v37 = vmax.f32 %v239_v34, %v519_v35 }
  0xb4   :  { %2129 = vst [vmem:[%s2602_s3 + $0x8] sm:$0xff] %v2079_v32   ;;  %v1233_v36 = vmax.f32 %v917_v33, %v1149_v31  ;;  %v2070_v31 = vld [vmem:[%s2600_s0 + $0x218] sm:$0xff] }
  0xb6   :  { %v1273_v42 = vadd.f32 %v2327_v53, %v1233_v36 }
  0xb8   :  { %vm1309_vm7 = vcmp.gt.f32.partialorder %v1273_v42, 1.0 }
  0xb9   :  { %v835_v38 = vpop.f32.mrf.mxu2  ;;  %v1151_v39 = vpop.f32.mrf.mxu3  ;;  %v1969_v51 = vsel %vm1309_vm7, 1.0, %v2150_v4 }
  0xba   :  { %v918_v43 = vmax.f32 %v602_v37, %v835_v38  ;;  %v242_v44 = vpop.f32.mrf.mxu0  ;;  %v522_v45 = vpop.f32.mrf.mxu1 }
  0xbb   :  { %v603_v50 = vmax.f32 %v242_v44, %v522_v45 }
  0xbc   :  { %v1234_v48 = vmax.f32 %v918_v43, %v1151_v39 }
  0xbd   :  { %1580 = vmatmul.msk.bf16.gmra.mxu0 %vm156_vm2, %v2014_v40  ;;  %1706 = vmatmul.msk.bf16.gmra.mxu1 %vm156_vm2, %v2032_v41 }
  0xbe   :  { %v1274_v49 = vadd.f32 %v2327_v53, %v1234_v48  ;;  %1832 = vmatmul.msk.bf16.gmra.mxu2 %vm156_vm2, %v2050_v46  ;;  %1958 = vmatmul.msk.bf16.gmra.mxu3 %vm156_vm2, %v2068_v47  ;;  %v2017_v47 = vld [vmem:[%s2600_s0 + $0x70] sm:$0xff]  ;;  %v2035_v48 = vld [vmem:[%s2600_s0 + $0x100] sm:$0xff] }
  0xc0   :  { %vm1310_vm8 = vcmp.gt.f32.partialorder %v1274_v49, 1.0 }
  0xc1   :  { %v1970_v52 = vsel %vm1310_vm8, 1.0, %v2150_v4  ;;  %v838_v54 = vpop.f32.mrf.mxu2  ;;  %v1154_v55 = vpop.f32.mrf.mxu3 }
  0xc2   :  { %v2082_v56 = vpack.c.bf16 %v1970_v52, %v1969_v51  ;;  %v919_v57 = vmax.f32 %v603_v50, %v838_v54  ;;  %v244_v58 = vpop.f32.mrf.mxu0  ;;  %v524_v59 = vpop.f32.mrf.mxu1  ;;  %v2053_v54 = vld [vmem:[%s2600_s0 + $0x190] sm:$0xff] }
  0xc3   :  { %v604_v61 = vmax.f32 %v244_v58, %v524_v59 }
  0xc4   :  { %2130 = vst [vmem:[%s2602_s3 + $0x10] sm:$0xff] %v2082_v56   ;;  %v1235_v60 = vmax.f32 %v919_v57, %v1154_v55  ;;  %v2071_v55 = vld [vmem:[%s2600_s0 + $0x220] sm:$0xff] }
  0xc6   :  { %v1275_v2 = vadd.f32 %v2327_v53, %v1235_v60 }
  0xc8   :  { %vm1311_vm9 = vcmp.gt.f32.partialorder %v1275_v2, 1.0 }
  0xc9   :  { %v840_v62 = vpop.f32.mrf.mxu2  ;;  %v1156_v63 = vpop.f32.mrf.mxu3  ;;  %v1971_v12 = vsel %vm1311_vm9, 1.0, %v2150_v4 }
  0xca   :  { %v920_v3 = vmax.f32 %v604_v61, %v840_v62  ;;  %v247_v5 = vpop.f32.mrf.mxu0  ;;  %v527_v6 = vpop.f32.mrf.mxu1 }
  0xcb   :  { %v605_v11 = vmax.f32 %v247_v5, %v527_v6 }
  0xcc   :  { %v1236_v9 = vmax.f32 %v920_v3, %v1156_v63 }
  0xcd   :  { %1581 = vmatmul.msk.bf16.gmra.mxu0 %vm156_vm2, %v2015_v0  ;;  %1707 = vmatmul.msk.bf16.gmra.mxu1 %vm156_vm2, %v2033_v1 }
  0xce   :  { %v1276_v10 = vadd.f32 %v2327_v53, %v1236_v9  ;;  %1833 = vmatmul.msk.bf16.gmra.mxu2 %vm156_vm2, %v2051_v7  ;;  %1959 = vmatmul.msk.bf16.gmra.mxu3 %vm156_vm2, %v2069_v8  ;;  %v2018_v8 = vld [vmem:[%s2600_s0 + $0x78] sm:$0xff]  ;;  %v2036_v9 = vld [vmem:[%s2600_s0 + $0x108] sm:$0xff] }
  0xd0   :  { %vm1312_vm10 = vcmp.gt.f32.partialorder %v1276_v10, 1.0 }
  0xd1   :  { %v1972_v13 = vsel %vm1312_vm10, 1.0, %v2150_v4  ;;  %v843_v14 = vpop.f32.mrf.mxu2  ;;  %v1159_v15 = vpop.f32.mrf.mxu3 }
  0xd2   :  { %v2085_v16 = vpack.c.bf16 %v1972_v13, %v1971_v12  ;;  %v921_v17 = vmax.f32 %v605_v11, %v843_v14  ;;  %v249_v18 = vpop.f32.mrf.mxu0  ;;  %v529_v19 = vpop.f32.mrf.mxu1  ;;  %v2054_v14 = vld [vmem:[%s2600_s0 + $0x198] sm:$0xff] }
  0xd3   :  { %v606_v21 = vmax.f32 %v249_v18, %v529_v19 }
  0xd4   :  { %2131 = vst [vmem:[%s2602_s3 + $0x18] sm:$0xff] %v2085_v16   ;;  %v1237_v20 = vmax.f32 %v921_v17, %v1159_v15  ;;  %v2072_v15 = vld [vmem:[%s2600_s0 + $0x228] sm:$0xff] }
  0xd6   :  { %v1277_v26 = vadd.f32 %v2327_v53, %v1237_v20 }
  0xd8   :  { %vm1313_vm11 = vcmp.gt.f32.partialorder %v1277_v26, 1.0 }
  0xd9   :  { %v845_v22 = vpop.f32.mrf.mxu2  ;;  %v1161_v23 = vpop.f32.mrf.mxu3  ;;  %v1973_v35 = vsel %vm1313_vm11, 1.0, %v2150_v4 }
  0xda   :  { %v922_v27 = vmax.f32 %v606_v21, %v845_v22  ;;  %v252_v28 = vpop.f32.mrf.mxu0  ;;  %v532_v29 = vpop.f32.mrf.mxu1 }
  0xdb   :  { %v607_v34 = vmax.f32 %v252_v28, %v532_v29 }
  0xdc   :  { %v1238_v32 = vmax.f32 %v922_v27, %v1161_v23 }
  0xdd   :  { %1582 = vmatmul.msk.bf16.gmra.mxu0 %vm156_vm2, %v2016_v24  ;;  %1708 = vmatmul.msk.bf16.gmra.mxu1 %vm156_vm2, %v2034_v25 }
  0xde   :  { %v1278_v33 = vadd.f32 %v2327_v53, %v1238_v32  ;;  %1834 = vmatmul.msk.bf16.gmra.mxu2 %vm156_vm2, %v2052_v30  ;;  %1960 = vmatmul.msk.bf16.gmra.mxu3 %vm156_vm2, %v2070_v31  ;;  %v2019_v31 = vld [vmem:[%s2600_s0 + $0x80] sm:$0xff]  ;;  %v2037_v32 = vld [vmem:[%s2600_s0 + $0x110] sm:$0xff] }
  0xe0   :  { %vm1314_vm12 = vcmp.gt.f32.partialorder %v1278_v33, 1.0 }
  0xe1   :  { %v1974_v36 = vsel %vm1314_vm12, 1.0, %v2150_v4  ;;  %v848_v37 = vpop.f32.mrf.mxu2  ;;  %v1164_v38 = vpop.f32.mrf.mxu3 }
  0xe2   :  { %v2088_v39 = vpack.c.bf16 %v1974_v36, %v1973_v35  ;;  %v923_v40 = vmax.f32 %v607_v34, %v848_v37  ;;  %v254_v41 = vpop.f32.mrf.mxu0  ;;  %v534_v42 = vpop.f32.mrf.mxu1  ;;  %v2055_v37 = vld [vmem:[%s2600_s0 + $0x1a0] sm:$0xff] }
  0xe3   :  { %v608_v44 = vmax.f32 %v254_v41, %v534_v42 }
  0xe4   :  { %2132 = vst [vmem:[%s2602_s3 + $0x20] sm:$0xff] %v2088_v39   ;;  %v1239_v43 = vmax.f32 %v923_v40, %v1164_v38  ;;  %v2073_v38 = vld [vmem:[%s2600_s0 + $0x230] sm:$0xff] }
  0xe6   :  { %v1279_v49 = vadd.f32 %v2327_v53, %v1239_v43 }
  0xe8   :  { %vm1315_vm13 = vcmp.gt.f32.partialorder %v1279_v49, 1.0 }
  0xe9   :  { %v850_v45 = vpop.f32.mrf.mxu2  ;;  %v1166_v46 = vpop.f32.mrf.mxu3  ;;  %v1975_v59 = vsel %vm1315_vm13, 1.0, %v2150_v4 }
  0xea   :  { %v924_v50 = vmax.f32 %v608_v44, %v850_v45  ;;  %v257_v51 = vpop.f32.mrf.mxu0  ;;  %v537_v52 = vpop.f32.mrf.mxu1 }
  0xeb   :  { %v609_v58 = vmax.f32 %v257_v51, %v537_v52 }
  0xec   :  { %v1240_v56 = vmax.f32 %v924_v50, %v1166_v46 }
  0xed   :  { %1583 = vmatmul.msk.bf16.gmra.mxu0 %vm156_vm2, %v2017_v47  ;;  %1709 = vmatmul.msk.bf16.gmra.mxu1 %vm156_vm2, %v2035_v48 }
  0xee   :  { %v1280_v57 = vadd.f32 %v2327_v53, %v1240_v56  ;;  %1835 = vmatmul.msk.bf16.gmra.mxu2 %vm156_vm2, %v2053_v54  ;;  %1961 = vmatmul.msk.bf16.gmra.mxu3 %vm156_vm2, %v2071_v55  ;;  %v2020_v55 = vld [vmem:[%s2600_s0 + $0x88] sm:$0xff]  ;;  %v2038_v56 = vld [vmem:[%s2600_s0 + $0x118] sm:$0xff] }
  0xf0   :  { %vm1316_vm14 = vcmp.gt.f32.partialorder %v1280_v57, 1.0 }
  0xf1   :  { %v1976_v60 = vsel %vm1316_vm14, 1.0, %v2150_v4  ;;  %v853_v61 = vpop.f32.mrf.mxu2  ;;  %v1169_v62 = vpop.f32.mrf.mxu3 }
  0xf2   :  { %v2091_v63 = vpack.c.bf16 %v1976_v60, %v1975_v59  ;;  %v925_v0 = vmax.f32 %v609_v58, %v853_v61  ;;  %v259_v1 = vpop.f32.mrf.mxu0  ;;  %v539_v2 = vpop.f32.mrf.mxu1  ;;  %v2056_v61 = vld [vmem:[%s2600_s0 + $0x1a8] sm:$0xff] }
  0xf3   :  { %v610_v5 = vmax.f32 %v259_v1, %v539_v2 }
  0xf4   :  { %2133 = vst [vmem:[%s2602_s3 + $0x28] sm:$0xff] %v2091_v63   ;;  %v1241_v3 = vmax.f32 %v925_v0, %v1169_v62  ;;  %v2074_v62 = vld [vmem:[%s2600_s0 + $0x238] sm:$0xff] }
  0xf6   :  { %v1281_v10 = vadd.f32 %v2327_v53, %v1241_v3 }
  0xf8   :  { %vm1317_vm15 = vcmp.gt.f32.partialorder %v1281_v10, 1.0 }
  0xf9   :  { %v855_v6 = vpop.f32.mrf.mxu2  ;;  %v1171_v7 = vpop.f32.mrf.mxu3  ;;  %v1977_v19 = vsel %vm1317_vm15, 1.0, %v2150_v4 }
  0xfa   :  { %v926_v11 = vmax.f32 %v610_v5, %v855_v6  ;;  %v262_v12 = vpop.f32.mrf.mxu0  ;;  %v542_v13 = vpop.f32.mrf.mxu1 }
  0xfb   :  { %v611_v18 = vmax.f32 %v262_v12, %v542_v13 }
  0xfc   :  { %v1242_v16 = vmax.f32 %v926_v11, %v1171_v7 }
  0xfd   :  { %1584 = vmatmul.msk.bf16.gmra.mxu0 %vm156_vm2, %v2018_v8  ;;  %1710 = vmatmul.msk.bf16.gmra.mxu1 %vm156_vm2, %v2036_v9 }
  0xfe   :  { %v1282_v17 = vadd.f32 %v2327_v53, %v1242_v16  ;;  %1836 = vmatmul.msk.bf16.gmra.mxu2 %vm156_vm2, %v2054_v14  ;;  %1962 = vmatmul.msk.bf16.gmra.mxu3 %vm156_vm2, %v2072_v15 }
 0x100   :  { %vm1318_vm0 = vcmp.gt.f32.partialorder %v1282_v17, 1.0 }
 0x101   :  { %v1978_v20 = vsel %vm1318_vm0, 1.0, %v2150_v4  ;;  %v858_v21 = vpop.f32.mrf.mxu2  ;;  %v1174_v22 = vpop.f32.mrf.mxu3 }
 0x102   :  { %v2094_v23 = vpack.c.bf16 %v1978_v20, %v1977_v19  ;;  %v927_v24 = vmax.f32 %v611_v18, %v858_v21  ;;  %v264_v25 = vpop.f32.mrf.mxu0  ;;  %v544_v26 = vpop.f32.mrf.mxu1 }
 0x103   :  { %v612_v28 = vmax.f32 %v264_v25, %v544_v26 }
 0x104   :  { %2134 = vst [vmem:[%s2602_s3 + $0x30] sm:$0xff] %v2094_v23   ;;  %v1243_v27 = vmax.f32 %v927_v24, %v1174_v22 }
 0x106   :  { %v1283_v33 = vadd.f32 %v2327_v53, %v1243_v27 }
 0x108   :  { %vm1319_vm1 = vcmp.gt.f32.partialorder %v1283_v33, 1.0 }
 0x109   :  { %v860_v29 = vpop.f32.mrf.mxu2  ;;  %v1176_v30 = vpop.f32.mrf.mxu3  ;;  %v1979_v42 = vsel %vm1319_vm1, 1.0, %v2150_v4 }
 0x10a   :  { %v928_v34 = vmax.f32 %v612_v28, %v860_v29  ;;  %v267_v35 = vpop.f32.mrf.mxu0  ;;  %v547_v36 = vpop.f32.mrf.mxu1 }
 0x10b   :  { %v613_v41 = vmax.f32 %v267_v35, %v547_v36 }
 0x10c   :  { %v1244_v39 = vmax.f32 %v928_v34, %v1176_v30 }
 0x10d   :  { %1585 = vmatmul.msk.bf16.gmra.mxu0 %vm156_vm2, %v2019_v31  ;;  %1711 = vmatmul.msk.bf16.gmra.mxu1 %vm156_vm2, %v2037_v32 }
 0x10e   :  { %v1284_v40 = vadd.f32 %v2327_v53, %v1244_v39  ;;  %1837 = vmatmul.msk.bf16.gmra.mxu2 %vm156_vm2, %v2055_v37  ;;  %1963 = vmatmul.msk.bf16.gmra.mxu3 %vm156_vm2, %v2073_v38 }
 0x110   :  { %vm1320_vm3 = vcmp.gt.f32.partialorder %v1284_v40, 1.0 }
 0x111   :  { %v1980_v43 = vsel %vm1320_vm3, 1.0, %v2150_v4  ;;  %v863_v44 = vpop.f32.mrf.mxu2  ;;  %v1179_v45 = vpop.f32.mrf.mxu3 }
 0x112   :  { %v2097_v46 = vpack.c.bf16 %v1980_v43, %v1979_v42  ;;  %v929_v47 = vmax.f32 %v613_v41, %v863_v44  ;;  %v269_v48 = vpop.f32.mrf.mxu0  ;;  %v549_v49 = vpop.f32.mrf.mxu1 }
 0x113   :  { %v614_v51 = vmax.f32 %v269_v48, %v549_v49 }
 0x114   :  { %2135 = vst [vmem:[%s2602_s3 + $0x38] sm:$0xff] %v2097_v46   ;;  %v1245_v50 = vmax.f32 %v929_v47, %v1179_v45 }
 0x116   :  { %v1285_v57 = vadd.f32 %v2327_v53, %v1245_v50 }
 0x118   :  { %vm1321_vm4 = vcmp.gt.f32.partialorder %v1285_v57, 1.0 }
 0x119   :  { %v865_v52 = vpop.f32.mrf.mxu2  ;;  %v1181_v54 = vpop.f32.mrf.mxu3  ;;  %v1981_v2 = vsel %vm1321_vm4, 1.0, %v2150_v4 }
 0x11a   :  { %v930_v58 = vmax.f32 %v614_v51, %v865_v52  ;;  %v272_v59 = vpop.f32.mrf.mxu0  ;;  %v552_v60 = vpop.f32.mrf.mxu1 }
 0x11b   :  { %v615_v1 = vmax.f32 %v272_v59, %v552_v60 }
 0x11c   :  { %v1246_v63 = vmax.f32 %v930_v58, %v1181_v54 }
 0x11d   :  { %1586 = vmatmul.msk.bf16.gmra.mxu0 %vm156_vm2, %v2020_v55  ;;  %1712 = vmatmul.msk.bf16.gmra.mxu1 %vm156_vm2, %v2038_v56 }
 0x11e   :  { %v1286_v0 = vadd.f32 %v2327_v53, %v1246_v63  ;;  %1838 = vmatmul.msk.bf16.gmra.mxu2 %vm156_vm2, %v2056_v61  ;;  %1964 = vmatmul.msk.bf16.gmra.mxu3 %vm156_vm2, %v2074_v62 }
 0x120   :  { %vm1322_vm5 = vcmp.gt.f32.partialorder %v1286_v0, 1.0 }
 0x121   :  { %v1982_v3 = vsel %vm1322_vm5, 1.0, %v2150_v4  ;;  %v868_v5 = vpop.f32.mrf.mxu2  ;;  %v1184_v6 = vpop.f32.mrf.mxu3 }
 0x122   :  { %v2100_v7 = vpack.c.bf16 %v1982_v3, %v1981_v2  ;;  %v931_v8 = vmax.f32 %v615_v1, %v868_v5  ;;  %v274_v9 = vpop.f32.mrf.mxu0  ;;  %v554_v10 = vpop.f32.mrf.mxu1 }
 0x123   :  { %v616_v12 = vmax.f32 %v274_v9, %v554_v10 }
 0x124   :  { %2136 = vst [vmem:[%s2602_s3 + $0x40] sm:$0xff] %v2100_v7   ;;  %v1247_v11 = vmax.f32 %v931_v8, %v1184_v6 }
 0x126   :  { %v1287_v15 = vadd.f32 %v2327_v53, %v1247_v11 }
 0x128   :  { %vm1323_vm2 = vcmp.gt.f32.partialorder %v1287_v15, 1.0 }
 0x129   :  { %v870_v13 = vpop.f32.mrf.mxu2  ;;  %v1186_v14 = vpop.f32.mrf.mxu3  ;;  %v1983_v22 = vsel %vm1323_vm2, 1.0, %v2150_v4 }
 0x12a   :  { %v932_v16 = vmax.f32 %v616_v12, %v870_v13  ;;  %v277_v17 = vpop.f32.mrf.mxu0  ;;  %v557_v18 = vpop.f32.mrf.mxu1 }
 0x12b   :  { %v617_v21 = vmax.f32 %v277_v17, %v557_v18 }
 0x12c   :  { %v1248_v19 = vmax.f32 %v932_v16, %v1186_v14 }
 0x12e   :  { %v1288_v20 = vadd.f32 %v2327_v53, %v1248_v19 }
 0x130   :  { %vm1324_vm6 = vcmp.gt.f32.partialorder %v1288_v20, 1.0 }
 0x131   :  { %v1984_v23 = vsel %vm1324_vm6, 1.0, %v2150_v4  ;;  %v873_v24 = vpop.f32.mrf.mxu2  ;;  %v1189_v25 = vpop.f32.mrf.mxu3 }
 0x132   :  { %v2103_v26 = vpack.c.bf16 %v1984_v23, %v1983_v22  ;;  %v933_v27 = vmax.f32 %v617_v21, %v873_v24  ;;  %v279_v28 = vpop.f32.mrf.mxu0  ;;  %v559_v29 = vpop.f32.mrf.mxu1 }
 0x133   :  { %v618_v31 = vmax.f32 %v279_v28, %v559_v29 }
 0x134   :  { %2137 = vst [vmem:[%s2602_s3 + $0x48] sm:$0xff] %v2103_v26   ;;  %v1249_v30 = vmax.f32 %v933_v27, %v1189_v25 }
 0x136   :  { %v1289_v34 = vadd.f32 %v2327_v53, %v1249_v30 }
 0x138   :  { %vm1325_vm7 = vcmp.gt.f32.partialorder %v1289_v34, 1.0 }
 0x139   :  { %v875_v32 = vpop.f32.mrf.mxu2  ;;  %v1191_v33 = vpop.f32.mrf.mxu3  ;;  %v1985_v41 = vsel %vm1325_vm7, 1.0, %v2150_v4 }
 0x13a   :  { %v934_v35 = vmax.f32 %v618_v31, %v875_v32  ;;  %v282_v36 = vpop.f32.mrf.mxu0  ;;  %v562_v37 = vpop.f32.mrf.mxu1 }
 0x13b   :  { %v619_v40 = vmax.f32 %v282_v36, %v562_v37 }
 0x13c   :  { %v1250_v38 = vmax.f32 %v934_v35, %v1191_v33 }
 0x13e   :  { %v1290_v39 = vadd.f32 %v2327_v53, %v1250_v38 }
 0x140   :  { %vm1326_vm8 = vcmp.gt.f32.partialorder %v1290_v39, 1.0 }
 0x141   :  { %v1986_v42 = vsel %vm1326_vm8, 1.0, %v2150_v4  ;;  %v878_v43 = vpop.f32.mrf.mxu2  ;;  %v1194_v44 = vpop.f32.mrf.mxu3 }
 0x142   :  { %v2106_v45 = vpack.c.bf16 %v1986_v42, %v1985_v41  ;;  %v935_v46 = vmax.f32 %v619_v40, %v878_v43  ;;  %v284_v47 = vpop.f32.mrf.mxu0  ;;  %v564_v48 = vpop.f32.mrf.mxu1 }
 0x143   :  { %v620_v50 = vmax.f32 %v284_v47, %v564_v48 }
 0x144   :  { %2138 = vst [vmem:[%s2602_s3 + $0x50] sm:$0xff] %v2106_v45   ;;  %v1251_v49 = vmax.f32 %v935_v46, %v1194_v44 }
 0x146   :  { %v1291_v54 = vadd.f32 %v2327_v53, %v1251_v49 }
 0x148   :  { %vm1327_vm9 = vcmp.gt.f32.partialorder %v1291_v54, 1.0 }
 0x149   :  { %v880_v51 = vpop.f32.mrf.mxu2  ;;  %v1196_v52 = vpop.f32.mrf.mxu3  ;;  %v1987_v61 = vsel %vm1327_vm9, 1.0, %v2150_v4 }
 0x14a   :  { %v936_v55 = vmax.f32 %v620_v50, %v880_v51  ;;  %v287_v56 = vpop.f32.mrf.mxu0  ;;  %v567_v57 = vpop.f32.mrf.mxu1 }
 0x14b   :  { %v621_v60 = vmax.f32 %v287_v56, %v567_v57 }
 0x14c   :  { %v1252_v58 = vmax.f32 %v936_v55, %v1196_v52 }
 0x14e   :  { %v1292_v59 = vadd.f32 %v2327_v53, %v1252_v58 }
 0x150   :  { %vm1328_vm10 = vcmp.gt.f32.partialorder %v1292_v59, 1.0 }
 0x151   :  { %v1988_v62 = vsel %vm1328_vm10, 1.0, %v2150_v4  ;;  %v883_v63 = vpop.f32.mrf.mxu2  ;;  %v1199_v0 = vpop.f32.mrf.mxu3 }
 0x152   :  { %v2109_v1 = vpack.c.bf16 %v1988_v62, %v1987_v61  ;;  %v937_v2 = vmax.f32 %v621_v60, %v883_v63  ;;  %v289_v3 = vpop.f32.mrf.mxu0  ;;  %v569_v5 = vpop.f32.mrf.mxu1 }
 0x153   :  { %v622_v7 = vmax.f32 %v289_v3, %v569_v5 }
 0x154   :  { %2139 = vst [vmem:[%s2602_s3 + $0x58] sm:$0xff] %v2109_v1   ;;  %v1253_v6 = vmax.f32 %v937_v2, %v1199_v0 }
 0x156   :  { %v1293_v10 = vadd.f32 %v2327_v53, %v1253_v6 }
 0x158   :  { %vm1329_vm11 = vcmp.gt.f32.partialorder %v1293_v10, 1.0 }
 0x159   :  { %v885_v8 = vpop.f32.mrf.mxu2  ;;  %v1201_v9 = vpop.f32.mrf.mxu3  ;;  %v1989_v17 = vsel %vm1329_vm11, 1.0, %v2150_v4 }
 0x15a   :  { %v938_v11 = vmax.f32 %v622_v7, %v885_v8  ;;  %v292_v12 = vpop.f32.mrf.mxu0  ;;  %v572_v13 = vpop.f32.mrf.mxu1 }
 0x15b   :  { %v623_v16 = vmax.f32 %v292_v12, %v572_v13 }
 0x15c   :  { %v1254_v14 = vmax.f32 %v938_v11, %v1201_v9 }
 0x15e   :  { %v1294_v15 = vadd.f32 %v2327_v53, %v1254_v14 }
 0x160   :  { %vm1330_vm12 = vcmp.gt.f32.partialorder %v1294_v15, 1.0 }
 0x161   :  { %v1990_v18 = vsel %vm1330_vm12, 1.0, %v2150_v4  ;;  %v888_v19 = vpop.f32.mrf.mxu2  ;;  %v1204_v20 = vpop.f32.mrf.mxu3 }
 0x162   :  { %v2112_v21 = vpack.c.bf16 %v1990_v18, %v1989_v17  ;;  %v939_v22 = vmax.f32 %v623_v16, %v888_v19  ;;  %v294_v23 = vpop.f32.mrf.mxu0  ;;  %v574_v24 = vpop.f32.mrf.mxu1 }
 0x163   :  { %v624_v26 = vmax.f32 %v294_v23, %v574_v24 }
 0x164   :  { %2140 = vst [vmem:[%s2602_s3 + $0x60] sm:$0xff] %v2112_v21   ;;  %v1255_v25 = vmax.f32 %v939_v22, %v1204_v20 }
 0x166   :  { %v1295_v29 = vadd.f32 %v2327_v53, %v1255_v25 }
 0x168   :  { %vm1331_vm13 = vcmp.gt.f32.partialorder %v1295_v29, 1.0 }
 0x169   :  { %v890_v27 = vpop.f32.mrf.mxu2  ;;  %v1206_v28 = vpop.f32.mrf.mxu3  ;;  %v1991_v36 = vsel %vm1331_vm13, 1.0, %v2150_v4 }
 0x16a   :  { %v940_v30 = vmax.f32 %v624_v26, %v890_v27  ;;  %v297_v31 = vpop.f32.mrf.mxu0  ;;  %v577_v32 = vpop.f32.mrf.mxu1 }
 0x16b   :  { %v625_v35 = vmax.f32 %v297_v31, %v577_v32 }
 0x16c   :  { %v1256_v33 = vmax.f32 %v940_v30, %v1206_v28 }
 0x16e   :  { %v1296_v34 = vadd.f32 %v2327_v53, %v1256_v33 }
 0x170   :  { %vm1332_vm14 = vcmp.gt.f32.partialorder %v1296_v34, 1.0 }
 0x171   :  { %v1992_v37 = vsel %vm1332_vm14, 1.0, %v2150_v4  ;;  %v893_v38 = vpop.f32.mrf.mxu2  ;;  %v1209_v39 = vpop.f32.mrf.mxu3 }
 0x172   :  { %v2115_v40 = vpack.c.bf16 %v1992_v37, %v1991_v36  ;;  %v941_v41 = vmax.f32 %v625_v35, %v893_v38  ;;  %v299_v42 = vpop.f32.mrf.mxu0  ;;  %v579_v43 = vpop.f32.mrf.mxu1 }
 0x173   :  { %v626_v45 = vmax.f32 %v299_v42, %v579_v43 }
 0x174   :  { %2141 = vst [vmem:[%s2602_s3 + $0x68] sm:$0xff] %v2115_v40   ;;  %v1257_v44 = vmax.f32 %v941_v41, %v1209_v39 }
 0x176   :  { %v1297_v48 = vadd.f32 %v2327_v53, %v1257_v44 }
 0x178   :  { %vm1333_vm15 = vcmp.gt.f32.partialorder %v1297_v48, 1.0 }
 0x179   :  { %v895_v46 = vpop.f32.mrf.mxu2  ;;  %v1211_v47 = vpop.f32.mrf.mxu3  ;;  %v1993_v56 = vsel %vm1333_vm15, 1.0, %v2150_v4 }
 0x17a   :  { %v942_v49 = vmax.f32 %v626_v45, %v895_v46  ;;  %v302_v50 = vpop.f32.mrf.mxu0  ;;  %v582_v51 = vpop.f32.mrf.mxu1 }
 0x17b   :  { %v627_v55 = vmax.f32 %v302_v50, %v582_v51 }
 0x17c   :  { %v1258_v52 = vmax.f32 %v942_v49, %v1211_v47 }
 0x17e   :  { %v1298_v54 = vadd.f32 %v2327_v53, %v1258_v52 }
 0x180   :  { %vm1334_vm0 = vcmp.gt.f32.partialorder %v1298_v54, 1.0 }
 0x181   :  { %v1994_v57 = vsel %vm1334_vm0, 1.0, %v2150_v4  ;;  %v898_v58 = vpop.f32.mrf.mxu2  ;;  %v1214_v59 = vpop.f32.mrf.mxu3 }
 0x182   :  { %v2118_v60 = vpack.c.bf16 %v1994_v57, %v1993_v56  ;;  %v943_v61 = vmax.f32 %v627_v55, %v898_v58  ;;  %v304_v62 = vpop.f32.mrf.mxu0  ;;  %v584_v63 = vpop.f32.mrf.mxu1 }
 0x183   :  { %v628_v1 = vmax.f32 %v304_v62, %v584_v63 }
 0x184   :  { %2142 = vst [vmem:[%s2602_s3 + $0x70] sm:$0xff] %v2118_v60   ;;  %v1259_v0 = vmax.f32 %v943_v61, %v1214_v59 }
 0x186   :  { %v1299_v5 = vadd.f32 %v2327_v53, %v1259_v0 }
 0x188   :  { %vm1335_vm1 = vcmp.gt.f32.partialorder %v1299_v5, 1.0 }
 0x189   :  { %v900_v2 = vpop.f32.mrf.mxu2  ;;  %v1216_v3 = vpop.f32.mrf.mxu3  ;;  %v1995_v12 = vsel %vm1335_vm1, 1.0, %v2150_v4 }
 0x18a   :  { %v944_v6 = vmax.f32 %v628_v1, %v900_v2  ;;  %v307_v7 = vpop.f32.mrf.mxu0  ;;  %v587_v8 = vpop.f32.mrf.mxu1 }
 0x18b   :  { %v629_v11 = vmax.f32 %v307_v7, %v587_v8 }
 0x18c   :  { %v1260_v9 = vmax.f32 %v944_v6, %v1216_v3 }
 0x18e   :  { %v1300_v10 = vadd.f32 %v2327_v53, %v1260_v9 }
 0x190   :  { %vm1336_vm3 = vcmp.gt.f32.partialorder %v1300_v10, 1.0 }
 0x191   :  { %v1996_v13 = vsel %vm1336_vm3, 1.0, %v2150_v4  ;;  %v903_v14 = vpop.f32.mrf.mxu2  ;;  %v1219_v15 = vpop.f32.mrf.mxu3 }
 0x192   :  { %v2121_v16 = vpack.c.bf16 %v1996_v13, %v1995_v12  ;;  %v945_v17 = vmax.f32 %v629_v11, %v903_v14  ;;  %v309_v18 = vpop.f32.mrf.mxu0  ;;  %v589_v19 = vpop.f32.mrf.mxu1 }
 0x193   :  { %v630_v21 = vmax.f32 %v309_v18, %v589_v19 }
 0x194   :  { %2143 = vst [vmem:[%s2602_s3 + $0x78] sm:$0xff] %v2121_v16   ;;  %v1261_v20 = vmax.f32 %v945_v17, %v1219_v15 }
 0x196   :  { %v1301_v24 = vadd.f32 %v2327_v53, %v1261_v20 }
 0x198   :  { %vm1337_vm4 = vcmp.gt.f32.partialorder %v1301_v24, 1.0 }
 0x199   :  { %v905_v22 = vpop.f32.mrf.mxu2  ;;  %v1221_v23 = vpop.f32.mrf.mxu3  ;;  %v1997_v31 = vsel %vm1337_vm4, 1.0, %v2150_v4 }
 0x19a   :  { %v946_v25 = vmax.f32 %v630_v21, %v905_v22  ;;  %v312_v26 = vpop.f32.mrf.mxu0  ;;  %v592_v27 = vpop.f32.mrf.mxu1 }
 0x19b   :  { %v631_v30 = vmax.f32 %v312_v26, %v592_v27 }
 0x19c   :  { %v1262_v28 = vmax.f32 %v946_v25, %v1221_v23 }
 0x19e   :  { %v1302_v29 = vadd.f32 %v2327_v53, %v1262_v28 }
 0x1a0   :  { %vm1338_vm5 = vcmp.gt.f32.partialorder %v1302_v29, 1.0 }
 0x1a1   :  { %v1998_v32 = vsel %vm1338_vm5, 1.0, %v2150_v4  ;;  %v908_v33 = vpop.f32.mrf.mxu2  ;;  %v1224_v34 = vpop.f32.mrf.mxu3 }
 0x1a2   :  { %v2124_v35 = vpack.c.bf16 %v1998_v32, %v1997_v31  ;;  %v947_v36 = vmax.f32 %v631_v30, %v908_v33  ;;  %v314_v37 = vpop.f32.mrf.mxu0  ;;  %v594_v38 = vpop.f32.mrf.mxu1 }
 0x1a3   :  { %v632_v40 = vmax.f32 %v314_v37, %v594_v38 }
 0x1a4   :  { %2144 = vst [vmem:[%s2602_s3 + $0x80] sm:$0xff] %v2124_v35   ;;  %v1263_v39 = vmax.f32 %v947_v36, %v1224_v34 }
 0x1a6   :  { %v1303_v42 = vadd.f32 %v2327_v53, %v1263_v39 }
 0x1a8   :  { %vm1339_vm2 = vcmp.gt.f32.partialorder %v1303_v42, 1.0 }
 0x1a9   :  { %v910_v41 = vpop.f32.mrf.mxu2  ;;  %v1226_v44 = vpop.f32.mrf.mxu3  ;;  %v1999_v47 = vsel %vm1339_vm2, 1.0, %v2150_v4 }
 0x1aa   :  { %v948_v43 = vmax.f32 %v632_v40, %v910_v41 }
 0x1ac   :  { %v1264_v45 = vmax.f32 %v948_v43, %v1226_v44 }
 0x1ae   :  { %v1304_v46 = vadd.f32 %v2327_v53, %v1264_v45 }
 0x1b0   :  { %vm1340_vm6 = vcmp.gt.f32.partialorder %v1304_v46, 1.0 }
 0x1b1   :  { %v2000_v48 = vsel %vm1340_vm6, 1.0, %v2150_v4 }
 0x1b2   :  { %v2127_v49 = vpack.c.bf16 %v2000_v48, %v1999_v47 }
 0x1b4   :  { %2145 = vst [vmem:[%s2602_s3 + $0x88] sm:$0xff] %v2127_v49  }

// kernel: net_forward.4
= control target key start
LH: loop header
LB: loop body
LE: loop exit
PB: predicated region body
PF: predicated region fallthrough
CT: control target
= control target key end

     0   :  { %s1320_s1 = inlined_call_operand.vmem [shape: bf16[384,128], index: 1, kind: input, shape index: {}]   ;;  %s1321_s0 = inlined_call_operand.vmem [shape: bf16[4,32,384], index: 0, kind: input, shape index: {}]   ;;  %s1322_s2 = inlined_call_operand.vmem [shape: f32[1,128], index: 2, kind: input, shape index: {}]   ;;  %s1323_s3 = inlined_call_operand.vmem [shape: bf16[32,128], index: 3, kind: output, shape index: {}]  }
   0x1   :  { %v942_v0 = vld [vmem:[%s1320_s1 + $0x38] sm:$0xff]  ;;  %v959_v3 = vld [vmem:[%s1320_s1 + $0x30] sm:$0xff]  ;;  %v978_v6 = vld [vmem:[%s1320_s1 + $0x28] sm:$0xff] }
   0x2   :  { %v947_v1 = vld [vmem:[%s1320_s1 + $0x78] sm:$0xff]  ;;  %246 = vmatpush.bf16.msra.mxu0 %v942_v0  ;;  %v964_v4 = vld [vmem:[%s1320_s1 + $0x70] sm:$0xff]  ;;  %344 = vmatpush.bf16.msra.mxu3 %v942_v0  ;;  %v983_v7 = vld [vmem:[%s1320_s1 + $0x68] sm:$0xff] }
   0x3   :  { %v952_v2 = vld [vmem:[%s1320_s1 + $0xb8] sm:$0xff]  ;;  %265 = vmatpush.bf16.msra.mxu1 %v947_v1  ;;  %v971_v5 = vld [vmem:[%s1320_s1 + $0xb0] sm:$0xff]  ;;  %v990_v8 = vld [vmem:[%s1320_s1 + $0xa8] sm:$0xff] }
   0x4   :  { %284 = vmatpush.bf16.msra.mxu2 %v952_v2  ;;  %v997_v9 = vld [vmem:[%s1320_s1 + $0x20] sm:$0xff]  ;;  %v1016_v12 = vld [vmem:[%s1320_s1 + $0x18] sm:$0xff]  ;;  %v1035_v15 = vld [vmem:[%s1320_s1 + $0x10] sm:$0xff] }
   0x5   :  { %v1002_v10 = vld [vmem:[%s1320_s1 + $0x60] sm:$0xff]  ;;  %v1021_v13 = vld [vmem:[%s1320_s1 + $0x58] sm:$0xff]  ;;  %v1040_v16 = vld [vmem:[%s1320_s1 + $0x50] sm:$0xff] }
   0x6   :  { %247 = vmatpush.bf16.msra.mxu0 %v959_v3  ;;  %345 = vmatpush.bf16.msra.mxu3 %v959_v3  ;;  %v1009_v11 = vld [vmem:[%s1320_s1 + $0xa0] sm:$0xff]  ;;  %v1028_v14 = vld [vmem:[%s1320_s1 + $0x98] sm:$0xff]  ;;  %v1047_v17 = vld [vmem:[%s1320_s1 + $0x90] sm:$0xff] }
   0x7   :  { %266 = vmatpush.bf16.msra.mxu1 %v964_v4  ;;  %v1054_v18 = vld [vmem:[%s1320_s1 + $0x8] sm:$0xff]  ;;  %v1071_v21 = vld [vmem:[%s1320_s1] sm:$0xff]  ;;  %v645_v27 = vld [vmem:[%s1321_s0 + $0xc] sm:$0xf0] }
   0x8   :  { %285 = vmatpush.bf16.msra.mxu2 %v971_v5  ;;  %v1059_v19 = vld [vmem:[%s1320_s1 + $0x48] sm:$0xff]  ;;  %v1076_v22 = vld [vmem:[%s1320_s1 + $0x40] sm:$0xff]  ;;  %v887_v29 = vld [vmem:[%s1321_s0 + $0x10] sm:$0xf0] }
   0x9   :  { %v1066_v20 = vld [vmem:[%s1320_s1 + $0x88] sm:$0xff]  ;;  %v1081_v23 = vld [vmem:[%s1320_s1 + $0x80] sm:$0xff]  ;;  %v771_v30 = vld [vmem:[%s1321_s0 + $0x30] sm:$0xf] }
   0xa   :  { %248 = vmatpush.bf16.msra.mxu0 %v978_v6  ;;  %346 = vmatpush.bf16.msra.mxu3 %v978_v6  ;;  %v643_v24 = vld [vmem:[%s1321_s0] sm:$0xf]  ;;  %v886_v25 = vld [vmem:[%s1321_s0 + $0x8] sm:$0xf0]  ;;  %v885_v26 = vld [vmem:[%s1321_s0 + $0x4] sm:$0xf] }
   0xb   :  { %267 = vmatpush.bf16.msra.mxu1 %v983_v7  ;;  %v651_v28 = vld [vmem:[%s1321_s0 + $0x8] sm:$0xf]  ;;  %v892_v31 = vld [vmem:[%s1321_s0 + $0x38] sm:$0xf0]  ;;  %v644_v32 = vor.u32 %v886_v25, %v643_v24  ;;  %v648_v33 = vor.u32 %v885_v26, %v645_v27  ;;  %v655_v36 = vld [vmem:[%s1321_s0 + $0x18] sm:$0xf] }
   0xc   :  { %286 = vmatpush.bf16.msra.mxu2 %v990_v8  ;;  %v652_v34 = vor.u32 %v887_v29, %v651_v28  ;;  %v772_v35 = vor.u32 %v892_v31, %v771_v30  ;;  %v889_v37 = vld [vmem:[%s1321_s0 + $0x20] sm:$0xf0]  ;;  %v888_v38 = vld [vmem:[%s1321_s0 + $0x1c] sm:$0xf]  ;;  %v657_v39 = vld [vmem:[%s1321_s0 + $0x24] sm:$0xf0] }
   0xd   :  { %v663_v40 = vld [vmem:[%s1321_s0 + $0x20] sm:$0xf]  ;;  %v890_v41 = vld [vmem:[%s1321_s0 + $0x28] sm:$0xf0]  ;;  %v783_v42 = vld [vmem:[%s1321_s0 + $0x48] sm:$0xf]  ;;  %v656_v44 = vor.u32 %v889_v37, %v655_v36  ;;  %v660_v45 = vor.u32 %v888_v38, %v657_v39 }
   0xe   :  { %249 = vmatpush.bf16.msra.mxu0 %v997_v9  ;;  %347 = vmatpush.bf16.msra.mxu3 %v997_v9  ;;  %v895_v43 = vld [vmem:[%s1321_s0 + $0x50] sm:$0xf0]  ;;  %v664_v46 = vor.u32 %v890_v41, %v663_v40  ;;  %v773_v49 = vld [vmem:[%s1321_s0 + $0x3c] sm:$0xf0]  ;;  %v779_v50 = vld [vmem:[%s1321_s0 + $0x38] sm:$0xf] }
   0xf   :  { %268 = vmatpush.bf16.msra.mxu1 %v1002_v10  ;;  %v784_v47 = vor.u32 %v895_v43, %v783_v42  ;;  %v891_v48 = vld [vmem:[%s1321_s0 + $0x34] sm:$0xf]  ;;  %v893_v51 = vld [vmem:[%s1321_s0 + $0x40] sm:$0xf0]  ;;  %v803_v52 = vld [vmem:[%s1321_s0 + $0x60] sm:$0xf] }
  0x10   :  { %287 = vmatpush.bf16.msra.mxu2 %v1009_v11  ;;  %v898_v53 = vld [vmem:[%s1321_s0 + $0x68] sm:$0xf0]  ;;  %v897_v54 = vld [vmem:[%s1321_s0 + $0x64] sm:$0xf]  ;;  %v805_v55 = vld [vmem:[%s1321_s0 + $0x6c] sm:$0xf0]  ;;  %v776_v56 = vor.u32 %v891_v48, %v773_v49  ;;  %v780_v57 = vor.u32 %v893_v51, %v779_v50 }
  0x11   :  { %v804_v58 = vor.u32 %v898_v53, %v803_v52  ;;  %v808_v59 = vor.u32 %v897_v54, %v805_v55  ;;  %v894_v60 = vld [vmem:[%s1321_s0 + $0x4c] sm:$0xf]  ;;  %v785_v61 = vld [vmem:[%s1321_s0 + $0x54] sm:$0xf0]  ;;  %v791_v62 = vld [vmem:[%s1321_s0 + $0x50] sm:$0xf] }
  0x12   :  { %250 = vmatpush.bf16.msra.mxu0 %v1016_v12  ;;  %348 = vmatpush.bf16.msra.mxu3 %v1016_v12  ;;  %v896_v63 = vld [vmem:[%s1321_s0 + $0x58] sm:$0xf0]  ;;  %v906_v24 = vld [vmem:[%s1321_s0 + $0xac] sm:$0xf]  ;;  %v849_v25 = vld [vmem:[%s1321_s0 + $0xb4] sm:$0xf0] }
  0x13   :  { %269 = vmatpush.bf16.msra.mxu1 %v1021_v13  ;;  %v855_v26 = vld [vmem:[%s1321_s0 + $0xb0] sm:$0xf]  ;;  %v908_v27 = vld [vmem:[%s1321_s0 + $0xb8] sm:$0xf0]  ;;  %v852_v30 = vor.u32 %v906_v24, %v849_v25 }
  0x14   :  { %288 = vmatpush.bf16.msra.mxu2 %v1028_v14  ;;  %v856_v31 = vor.u32 %v908_v27, %v855_v26  ;;  %v917_v27 = vld [vmem:[%s1322_s2] ss:$0 sm:$0xff] }
  0x16   :  { %251 = vmatpush.bf16.msra.mxu0 %v1035_v15  ;;  %349 = vmatpush.bf16.msra.mxu3 %v1035_v15 }
  0x17   :  { %270 = vmatpush.bf16.msra.mxu1 %v1040_v16 }
  0x18   :  { %289 = vmatpush.bf16.msra.mxu2 %v1047_v17 }
  0x1a   :  { %252 = vmatpush.bf16.msra.mxu0 %v1054_v18  ;;  %350 = vmatpush.bf16.msra.mxu3 %v1054_v18 }
  0x1b   :  { %271 = vmatpush.bf16.msra.mxu1 %v1059_v19 }
  0x1c   :  { %290 = vmatpush.bf16.msra.mxu2 %v1066_v20 }
  0x1e   :  { %253 = vmatpush.bf16.msra.mxu0 %v1071_v21  ;;  %351 = vmatpush.bf16.msra.mxu3 %v1071_v21 }
  0x1f   :  { %272 = vmatpush.bf16.msra.mxu1 %v1076_v22 }
  0x20   :  { %291 = vmatpush.bf16.msra.mxu2 %v1081_v23 }
  0x21   :  { %254 = vmatmul.bf16.vlgmr.msra.gmra.mxu0 %v644_v32  ;;  %352 = vmatmul.bf16.vlgmr.msra.gmra.mxu3 %v772_v35 }
  0x22   :  { %363 = vmatpush.bf16.msrb.mxu0 %v947_v1  ;;  %273 = vmatmul.bf16.vlgmr.msra.gmra.mxu1 %v648_v33 }
  0x23   :  { %292 = vmatmul.bf16.vlgmr.msra.gmra.mxu2 %v652_v34  ;;  %382 = vmatpush.bf16.msrb.mxu1 %v952_v2 }
  0x24   :  { %446 = vmatpush.bf16.msrb.mxu2 %v942_v0  ;;  %465 = vmatpush.bf16.msrb.mxu3 %v947_v1 }
  0x26   :  { %364 = vmatpush.bf16.msrb.mxu0 %v964_v4 }
  0x27   :  { %383 = vmatpush.bf16.msrb.mxu1 %v971_v5 }
  0x28   :  { %447 = vmatpush.bf16.msrb.mxu2 %v959_v3  ;;  %466 = vmatpush.bf16.msrb.mxu3 %v964_v4 }
  0x2a   :  { %365 = vmatpush.bf16.msrb.mxu0 %v983_v7 }
  0x2b   :  { %384 = vmatpush.bf16.msrb.mxu1 %v990_v8 }
  0x2c   :  { %448 = vmatpush.bf16.msrb.mxu2 %v978_v6  ;;  %467 = vmatpush.bf16.msrb.mxu3 %v983_v7 }
  0x2e   :  { %366 = vmatpush.bf16.msrb.mxu0 %v1002_v10 }
  0x2f   :  { %385 = vmatpush.bf16.msrb.mxu1 %v1009_v11 }
  0x30   :  { %449 = vmatpush.bf16.msrb.mxu2 %v997_v9  ;;  %468 = vmatpush.bf16.msrb.mxu3 %v1002_v10 }
  0x31   :  { %259 = vmatmul.bf16.gmra.mxu0 %v656_v44  ;;  %357 = vmatmul.bf16.gmra.mxu3 %v784_v47 }
  0x32   :  { %367 = vmatpush.bf16.msrb.mxu0 %v1021_v13  ;;  %278 = vmatmul.bf16.gmra.mxu1 %v660_v45 }
  0x33   :  { %297 = vmatmul.bf16.gmra.mxu2 %v664_v46  ;;  %386 = vmatpush.bf16.msrb.mxu1 %v1028_v14 }
  0x34   :  { %450 = vmatpush.bf16.msrb.mxu2 %v1016_v12  ;;  %469 = vmatpush.bf16.msrb.mxu3 %v1021_v13 }
  0x36   :  { %368 = vmatpush.bf16.msrb.mxu0 %v1040_v16 }
  0x37   :  { %387 = vmatpush.bf16.msrb.mxu1 %v1047_v17 }
  0x38   :  { %451 = vmatpush.bf16.msrb.mxu2 %v1035_v15  ;;  %470 = vmatpush.bf16.msrb.mxu3 %v1040_v16 }
  0x3a   :  { %369 = vmatpush.bf16.msrb.mxu0 %v1059_v19 }
  0x3b   :  { %388 = vmatpush.bf16.msrb.mxu1 %v1066_v20 }
  0x3c   :  { %452 = vmatpush.bf16.msrb.mxu2 %v1054_v18  ;;  %471 = vmatpush.bf16.msrb.mxu3 %v1059_v19 }
  0x3e   :  { %370 = vmatpush.bf16.msrb.mxu0 %v1076_v22 }
  0x3f   :  { %389 = vmatpush.bf16.msrb.mxu1 %v1081_v23 }
  0x40   :  { %453 = vmatpush.bf16.msrb.mxu2 %v1071_v21  ;;  %472 = vmatpush.bf16.msrb.mxu3 %v1076_v22 }
  0x41   :  { %371 = vmatmul.bf16.vlgmr.msrb.gmra.mxu0 %v776_v56 }
  0x42   :  { %484 = vmatpush.bf16.msra.mxu0 %v952_v2  ;;  %390 = vmatmul.bf16.vlgmr.msrb.gmra.mxu1 %v780_v57 }
  0x43   :  { %548 = vmatpush.bf16.msra.mxu1 %v942_v0  ;;  %454 = vmatmul.bf16.vlgmr.msrb.gmra.mxu2 %v804_v58  ;;  %v815_v0 = vld [vmem:[%s1321_s0 + $0x78] sm:$0xf] }
  0x44   :  { %567 = vmatpush.bf16.msra.mxu2 %v947_v1  ;;  %586 = vmatpush.bf16.msra.mxu3 %v952_v2  ;;  %v901_v1 = vld [vmem:[%s1321_s0 + $0x80] sm:$0xf0]  ;;  %v900_v2 = vld [vmem:[%s1321_s0 + $0x7c] sm:$0xf] }
  0x45   :  { %473 = vmatmul.bf16.vlgmr.msrb.gmra.mxu3 %v808_v59 }
  0x46   :  { %485 = vmatpush.bf16.msra.mxu0 %v971_v5 }
  0x47   :  { %549 = vmatpush.bf16.msra.mxu1 %v959_v3  ;;  %v817_v3 = vld [vmem:[%s1321_s0 + $0x84] sm:$0xf0] }
  0x48   :  { %568 = vmatpush.bf16.msra.mxu2 %v964_v4  ;;  %587 = vmatpush.bf16.msra.mxu3 %v971_v5  ;;  %v788_v4 = vor.u32 %v894_v60, %v785_v61  ;;  %v792_v5 = vor.u32 %v896_v63, %v791_v62 }
  0x4a   :  { %486 = vmatpush.bf16.msra.mxu0 %v990_v8 }
  0x4b   :  { %550 = vmatpush.bf16.msra.mxu1 %v978_v6  ;;  %v816_v6 = vor.u32 %v901_v1, %v815_v0 }
  0x4c   :  { %569 = vmatpush.bf16.msra.mxu2 %v983_v7  ;;  %588 = vmatpush.bf16.msra.mxu3 %v990_v8  ;;  %v820_v7 = vor.u32 %v900_v2, %v817_v3  ;;  %v811_v8 = vld [vmem:[%s1321_s0 + $0x68] sm:$0xf] }
  0x4e   :  { %487 = vmatpush.bf16.msra.mxu0 %v1009_v11 }
  0x4f   :  { %551 = vmatpush.bf16.msra.mxu1 %v997_v9  ;;  %v899_v9 = vld [vmem:[%s1321_s0 + $0x70] sm:$0xf0] }
  0x50   :  { %570 = vmatpush.bf16.msra.mxu2 %v1002_v10  ;;  %589 = vmatpush.bf16.msra.mxu3 %v1009_v11  ;;  %v835_v10 = vld [vmem:[%s1321_s0 + $0x90] sm:$0xf]  ;;  %v904_v11 = vld [vmem:[%s1321_s0 + $0x98] sm:$0xf0] }
  0x51   :  { %376 = vmatmul.bf16.gmra.mxu0 %v788_v4 }
  0x52   :  { %488 = vmatpush.bf16.msra.mxu0 %v1028_v14  ;;  %395 = vmatmul.bf16.gmra.mxu1 %v792_v5 }
  0x53   :  { %552 = vmatpush.bf16.msra.mxu1 %v1016_v12  ;;  %459 = vmatmul.bf16.gmra.mxu2 %v816_v6  ;;  %v903_v12 = vld [vmem:[%s1321_s0 + $0x94] sm:$0xf] }
  0x54   :  { %571 = vmatpush.bf16.msra.mxu2 %v1021_v13  ;;  %590 = vmatpush.bf16.msra.mxu3 %v1028_v14  ;;  %v837_v13 = vld [vmem:[%s1321_s0 + $0x9c] sm:$0xf0]  ;;  %v843_v14 = vld [vmem:[%s1321_s0 + $0x98] sm:$0xf] }
  0x55   :  { %478 = vmatmul.bf16.gmra.mxu3 %v820_v7 }
  0x56   :  { %489 = vmatpush.bf16.msra.mxu0 %v1047_v17 }
  0x57   :  { %553 = vmatpush.bf16.msra.mxu1 %v1035_v15  ;;  %v905_v15 = vld [vmem:[%s1321_s0 + $0xa0] sm:$0xf0] }
  0x58   :  { %572 = vmatpush.bf16.msra.mxu2 %v1040_v16  ;;  %591 = vmatpush.bf16.msra.mxu3 %v1047_v17  ;;  %v812_v16 = vor.u32 %v899_v9, %v811_v8  ;;  %v836_v17 = vor.u32 %v904_v11, %v835_v10 }
  0x5a   :  { %490 = vmatpush.bf16.msra.mxu0 %v1066_v20 }
  0x5b   :  { %554 = vmatpush.bf16.msra.mxu1 %v1054_v18  ;;  %v840_v18 = vor.u32 %v903_v12, %v837_v13 }
  0x5c   :  { %573 = vmatpush.bf16.msra.mxu2 %v1059_v19  ;;  %592 = vmatpush.bf16.msra.mxu3 %v1066_v20  ;;  %v844_v19 = vor.u32 %v905_v15, %v843_v14  ;;  %v823_v20 = vld [vmem:[%s1321_s0 + $0x80] sm:$0xf] }
  0x5e   :  { %491 = vmatpush.bf16.msra.mxu0 %v1081_v23 }
  0x5f   :  { %555 = vmatpush.bf16.msra.mxu1 %v1071_v21  ;;  %v902_v21 = vld [vmem:[%s1321_s0 + $0x88] sm:$0xf0] }
  0x60   :  { %574 = vmatpush.bf16.msra.mxu2 %v1076_v22  ;;  %593 = vmatpush.bf16.msra.mxu3 %v1081_v23  ;;  %v847_v22 = vld [vmem:[%s1321_s0 + $0xa8] sm:$0xf]  ;;  %v907_v23 = vld [vmem:[%s1321_s0 + $0xb0] sm:$0xf0]  ;;  %v824_v28 = vor.u32 %v902_v21, %v823_v20 }
  0x61   :  { %492 = vmatmul.bf16.vlgmr.msra.gmra.mxu0 %v812_v16  ;;  %v848_v29 = vor.u32 %v907_v23, %v847_v22 }
  0x62   :  { %556 = vmatmul.bf16.vlgmr.msra.gmra.mxu1 %v836_v17 }
  0x63   :  { %575 = vmatmul.bf16.vlgmr.msra.gmra.mxu2 %v840_v18 }
  0x65   :  { %594 = vmatmul.bf16.vlgmr.msra.gmra.mxu3 %v844_v19 }
  0x71   :  { %497 = vmatmul.bf16.gmra.mxu0 %v824_v28 }
  0x72   :  { %561 = vmatmul.bf16.gmra.mxu1 %v848_v29 }
  0x73   :  { %580 = vmatmul.bf16.gmra.mxu2 %v852_v30 }
  0x75   :  { %599 = vmatmul.bf16.gmra.mxu3 %v856_v31 }
  0x9e   :  { %v255_v32 = vpop.f32.mrf.mxu0 }
  0x9f   :  { %v274_v33 = vpop.f32.mrf.mxu1 }
  0xa0   :  { %v275_v34 = vadd.f32 %v274_v33, %v255_v32 }
  0xa4   :  { %v353_v36 = vpop.f32.mrf.mxu3 }
  0xa6   :  { %v293_v35 = vpop.f32.mrf.mxu2  ;;  %v257_v38 = vpop.f32.mrf.mxu0 }
  0xa7   :  { %v294_v37 = vadd.f32 %v293_v35, %v275_v34  ;;  %v276_v39 = vpop.f32.mrf.mxu1 }
  0xa8   :  { %v277_v21 = vadd.f32 %v276_v39, %v257_v38 }
  0xac   :  { %v355_v41 = vpop.f32.mrf.mxu3 }
  0xae   :  { %v295_v40 = vpop.f32.mrf.mxu2  ;;  %v260_v42 = vpop.f32.mrf.mxu0 }
  0xaf   :  { %v279_v43 = vpop.f32.mrf.mxu1  ;;  %v296_v25 = vadd.f32 %v295_v40, %v277_v21 }
  0xb0   :  { %v280_v44 = vadd.f32 %v279_v43, %v260_v42 }
  0xb4   :  { %v358_v46 = vpop.f32.mrf.mxu3 }
  0xb6   :  { %v298_v45 = vpop.f32.mrf.mxu2  ;;  %v1301_v48 = vpop.f32.mrf.mxu0 }
  0xb7   :  { %v1299_v47 = vadd.f32 %v298_v45, %v280_v44  ;;  %v1303_v49 = vpop.f32.mrf.mxu1 }
  0xbc   :  { %v360_v51 = vpop.f32.mrf.mxu3 }
  0xbe   :  { %v1305_v50 = vpop.f32.mrf.mxu2  ;;  %v372_v52 = vpop.f32.mrf.mxu0 }
  0xbf   :  { %v373_v53 = vadd.f32 %v372_v52, %v353_v36  ;;  %v391_v54 = vpop.f32.mrf.mxu1 }
  0xc1   :  { %v392_v55 = vadd.f32 %v391_v54, %v373_v53 }
  0xc3   :  { %v401_v56 = vmax.f32 %v294_v37, %v392_v55 }
  0xc6   :  { %v455_v57 = vpop.f32.mrf.mxu2  ;;  %v374_v59 = vpop.f32.mrf.mxu0 }
  0xc7   :  { %v393_v60 = vpop.f32.mrf.mxu1  ;;  %v375_v14 = vadd.f32 %v374_v59, %v355_v41 }
  0xc8   :  { %v474_v58 = vpop.f32.mrf.mxu3 }
  0xc9   :  { %v475_v12 = vadd.f32 %v474_v58, %v455_v57  ;;  %v394_v22 = vadd.f32 %v393_v60, %v375_v14 }
  0xcb   :  { %v402_v30 = vmax.f32 %v296_v25, %v394_v22 }
  0xce   :  { %v457_v61 = vpop.f32.mrf.mxu2  ;;  %v377_v63 = vpop.f32.mrf.mxu0 }
  0xcf   :  { %v378_v0 = vadd.f32 %v377_v63, %v358_v46  ;;  %v396_v1 = vpop.f32.mrf.mxu1  ;;  %v918_v46 = vmov 0.0  }
  0xd0   :  { %v476_v62 = vpop.f32.mrf.mxu3 }
  0xd1   :  { %v397_v2 = vadd.f32 %v396_v1, %v378_v0  ;;  %v477_v23 = vadd.f32 %v476_v62, %v457_v61 }
  0xd3   :  { %v403_v3 = vmax.f32 %v1299_v47, %v397_v2 }
  0xd6   :  { %v460_v4 = vpop.f32.mrf.mxu2  ;;  %v379_v6 = vpop.f32.mrf.mxu0 }
  0xd7   :  { %v398_v7 = vpop.f32.mrf.mxu1  ;;  %v380_v42 = vadd.f32 %v379_v6, %v360_v51 }
  0xd8   :  { %v479_v5 = vpop.f32.mrf.mxu3 }
  0xd9   :  { %v480_v39 = vadd.f32 %v479_v5, %v460_v4  ;;  %v399_v57 = vadd.f32 %v398_v7, %v380_v42 }
  0xde   :  { %v462_v8 = vpop.f32.mrf.mxu2  ;;  %v493_v10 = vpop.f32.mrf.mxu0 }
  0xdf   :  { %v557_v11 = vpop.f32.mrf.mxu1  ;;  %v494_v15 = vadd.f32 %v493_v10, %v475_v12 }
  0xe0   :  { %v481_v9 = vpop.f32.mrf.mxu3 }
  0xe1   :  { %v503_v24 = vmax.f32 %v401_v56, %v494_v15  ;;  %v282_v56 = vadd.f32 %v1303_v49, %v1301_v48  ;;  %v482_v58 = vadd.f32 %v481_v9, %v462_v8 }
  0xe3   :  { %v301_v59 = vadd.f32 %v1305_v50, %v282_v56 }
  0xe5   :  { %v404_v0 = vmax.f32 %v301_v59, %v399_v57 }
  0xe6   :  { %v576_v13 = vpop.f32.mrf.mxu2  ;;  %v495_v18 = vpop.f32.mrf.mxu0 }
  0xe7   :  { %v577_v16 = vadd.f32 %v576_v13, %v557_v11  ;;  %v559_v20 = vpop.f32.mrf.mxu1  ;;  %v496_v28 = vadd.f32 %v495_v18, %v477_v23 }
  0xe8   :  { %v595_v17 = vpop.f32.mrf.mxu3 }
  0xe9   :  { %v596_v19 = vadd.f32 %v595_v17, %v577_v16  ;;  %v504_v35 = vmax.f32 %v402_v30, %v496_v28 }
  0xeb   :  { %v605_v26 = vmax.f32 %v503_v24, %v596_v19 }
  0xed   :  { %v613_v34 = vadd.f32 %v917_v27, %v605_v26 }
  0xee   :  { %v578_v29 = vpop.f32.mrf.mxu2  ;;  %v498_v33 = vpop.f32.mrf.mxu0 }
  0xef   :  { %v579_v31 = vadd.f32 %v578_v29, %v559_v20  ;;  %v562_v38 = vpop.f32.mrf.mxu1  ;;  %vm617_vm0 = vcmp.gt.f32.partialorder %v613_v34, 1.0  ;;  %v499_v43 = vadd.f32 %v498_v33, %v480_v39 }
  0xf0   :  { %v597_v32 = vpop.f32.mrf.mxu3  ;;  %v857_v47 = vsel %vm617_vm0, 1.0, %v918_v46 }
  0xf1   :  { %v598_v36 = vadd.f32 %v597_v32, %v579_v31  ;;  %v505_v51 = vmax.f32 %v403_v3, %v499_v43 }
  0xf3   :  { %v606_v37 = vmax.f32 %v504_v35, %v598_v36 }
  0xf5   :  { %v614_v41 = vadd.f32 %v917_v27, %v606_v37 }
  0xf6   :  { %v581_v40 = vpop.f32.mrf.mxu2  ;;  %v500_v55 = vpop.f32.mrf.mxu0 }
  0xf7   :  { %vm618_vm1 = vcmp.gt.f32.partialorder %v614_v41, 1.0  ;;  %v582_v44 = vadd.f32 %v581_v40, %v562_v38  ;;  %v501_v61 = vadd.f32 %v500_v55, %v482_v58  ;;  %v564_v62 = vpop.f32.mrf.mxu1 }
  0xf8   :  { %v600_v45 = vpop.f32.mrf.mxu3  ;;  %v858_v52 = vsel %vm618_vm1, 1.0, %v918_v46 }
  0xf9   :  { %v910_v53 = vpack.c.bf16 %v858_v52, %v857_v47  ;;  %v601_v54 = vadd.f32 %v600_v45, %v582_v44  ;;  %v506_v5 = vmax.f32 %v404_v0, %v501_v61 }
  0xfb   :  { %911 = vst [vmem:[%s1323_s3] sm:$0xff] %v910_v53   ;;  %v607_v60 = vmax.f32 %v505_v51, %v601_v54 }
  0xfd   :  { %v615_v4 = vadd.f32 %v917_v27, %v607_v60 }
  0xfe   :  { %v583_v63 = vpop.f32.mrf.mxu2 }
  0xff   :  { %v584_v1 = vadd.f32 %v583_v63, %v564_v62  ;;  %vm619_vm2 = vcmp.gt.f32.partialorder %v615_v4, 1.0 }
 0x100   :  { %v602_v2 = vpop.f32.mrf.mxu3  ;;  %v859_v7 = vsel %vm619_vm2, 1.0, %v918_v46 }
 0x101   :  { %v603_v6 = vadd.f32 %v602_v2, %v584_v1 }
 0x103   :  { %v608_v48 = vmax.f32 %v506_v5, %v603_v6 }
 0x105   :  { %v616_v49 = vadd.f32 %v917_v27, %v608_v48 }
 0x107   :  { %vm620_vm3 = vcmp.gt.f32.partialorder %v616_v49, 1.0 }
 0x108   :  { %v860_v8 = vsel %vm620_vm3, 1.0, %v918_v46 }
 0x109   :  { %v913_v9 = vpack.c.bf16 %v860_v8, %v859_v7 }
 0x10b   :  { %915 = vst [vmem:[%s1323_s3 + $0x8] sm:$0xff] %v913_v9  }

// kernel: net_forward.5
= control target key start
LH: loop header
LB: loop body
LE: loop exit
PB: predicated region body
PF: predicated region fallthrough
CT: control target
= control target key end

     0   :  { %s2627_s1 = inlined_call_operand.vmem [shape: bf16[2048,128], index: 1, kind: input, shape index: {}]   ;;  %s2628_s2 = inlined_call_operand.vmem [shape: f32[1,128], index: 2, kind: input, shape index: {}]   ;;  %s2629_s0 = inlined_call_operand.vmem [shape: bf16[16,2048], index: 0, kind: input, shape index: {}]   ;;  %s2630_s4 = inlined_call_operand.vmem [shape: f32[16,128], index: 4, kind: output, shape index: {1}]   ;;  %s2631_s3 = inlined_call_operand.vmem [shape: f32[16,128], index: 3, kind: output, shape index: {0}]  }
   0x1   :  { %v1983_v0 = vld [vmem:[%s2627_s1 + $0x38] sm:$0xff]  ;;  %v1982_v4 = vld [vmem:[%s2627_s1 + $0x30] sm:$0xff]  ;;  %v1981_v8 = vld [vmem:[%s2627_s1 + $0x28] sm:$0xff] }
   0x2   :  { %v1991_v1 = vld [vmem:[%s2627_s1 + $0x78] sm:$0xff]  ;;  %1140 = vmatpush.bf16.msra.mxu0 %v1983_v0  ;;  %v1990_v5 = vld [vmem:[%s2627_s1 + $0x70] sm:$0xff]  ;;  %v1989_v9 = vld [vmem:[%s2627_s1 + $0x68] sm:$0xff] }
   0x3   :  { %v1999_v2 = vld [vmem:[%s2627_s1 + $0xb8] sm:$0xff]  ;;  %1154 = vmatpush.bf16.msra.mxu1 %v1991_v1  ;;  %v1998_v6 = vld [vmem:[%s2627_s1 + $0xb0] sm:$0xff]  ;;  %v1997_v10 = vld [vmem:[%s2627_s1 + $0xa8] sm:$0xff] }
   0x4   :  { %v2007_v3 = vld [vmem:[%s2627_s1 + $0xf8] sm:$0xff]  ;;  %1168 = vmatpush.bf16.msra.mxu2 %v1999_v2  ;;  %v2006_v7 = vld [vmem:[%s2627_s1 + $0xf0] sm:$0xff]  ;;  %v2005_v11 = vld [vmem:[%s2627_s1 + $0xe8] sm:$0xff] }
   0x5   :  { %1182 = vmatpush.bf16.msra.mxu3 %v2007_v3  ;;  %v1980_v12 = vld [vmem:[%s2627_s1 + $0x20] sm:$0xff]  ;;  %v1979_v16 = vld [vmem:[%s2627_s1 + $0x18] sm:$0xff]  ;;  %v1978_v20 = vld [vmem:[%s2627_s1 + $0x10] sm:$0xff] }
   0x6   :  { %1141 = vmatpush.bf16.msra.mxu0 %v1982_v4  ;;  %v1988_v13 = vld [vmem:[%s2627_s1 + $0x60] sm:$0xff]  ;;  %v1987_v17 = vld [vmem:[%s2627_s1 + $0x58] sm:$0xff]  ;;  %v1986_v21 = vld [vmem:[%s2627_s1 + $0x50] sm:$0xff] }
   0x7   :  { %1155 = vmatpush.bf16.msra.mxu1 %v1990_v5  ;;  %v1996_v14 = vld [vmem:[%s2627_s1 + $0xa0] sm:$0xff]  ;;  %v1995_v18 = vld [vmem:[%s2627_s1 + $0x98] sm:$0xff]  ;;  %v1994_v22 = vld [vmem:[%s2627_s1 + $0x90] sm:$0xff] }
   0x8   :  { %1169 = vmatpush.bf16.msra.mxu2 %v1998_v6  ;;  %v2004_v15 = vld [vmem:[%s2627_s1 + $0xe0] sm:$0xff]  ;;  %v2003_v19 = vld [vmem:[%s2627_s1 + $0xd8] sm:$0xff]  ;;  %v2002_v23 = vld [vmem:[%s2627_s1 + $0xd0] sm:$0xff] }
   0x9   :  { %1183 = vmatpush.bf16.msra.mxu3 %v2006_v7  ;;  %v1977_v24 = vld [vmem:[%s2627_s1 + $0x8] sm:$0xff]  ;;  %v1976_v28 = vld [vmem:[%s2627_s1] sm:$0xff]  ;;  %v2015_v32 = vld [vmem:[%s2627_s1 + $0x138] sm:$0xff] }
   0xa   :  { %1142 = vmatpush.bf16.msra.mxu0 %v1981_v8  ;;  %v1985_v25 = vld [vmem:[%s2627_s1 + $0x48] sm:$0xff]  ;;  %v1984_v29 = vld [vmem:[%s2627_s1 + $0x40] sm:$0xff]  ;;  %v2023_v33 = vld [vmem:[%s2627_s1 + $0x178] sm:$0xff] }
   0xb   :  { %1156 = vmatpush.bf16.msra.mxu1 %v1989_v9  ;;  %v1993_v26 = vld [vmem:[%s2627_s1 + $0x88] sm:$0xff]  ;;  %v1992_v30 = vld [vmem:[%s2627_s1 + $0x80] sm:$0xff]  ;;  %v2031_v42 = vld [vmem:[%s2627_s1 + $0x1b8] sm:$0xff] }
   0xc   :  { %1170 = vmatpush.bf16.msra.mxu2 %v1997_v10  ;;  %v2001_v27 = vld [vmem:[%s2627_s1 + $0xc8] sm:$0xff]  ;;  %v2000_v31 = vld [vmem:[%s2627_s1 + $0xc0] sm:$0xff]  ;;  %v2039_v43 = vld [vmem:[%s2627_s1 + $0x1f8] sm:$0xff] }
   0xd   :  { %1184 = vmatpush.bf16.msra.mxu3 %v2005_v11  ;;  %v1384_v34 = vld [vmem:[%s2629_s0] sm:$0xf]  ;;  %v1392_v36 = vld [vmem:[%s2629_s0 + $0x8] sm:$0xf]  ;;  %v1960_v38 = vld [vmem:[%s2629_s0 + $0x4] sm:$0xf] }
   0xe   :  { %1143 = vmatpush.bf16.msra.mxu0 %v1980_v12  ;;  %v1968_v35 = vld [vmem:[%s2629_s0 + $0x3c] sm:$0xf0]  ;;  %v1969_v37 = vld [vmem:[%s2629_s0 + $0x44] sm:$0xf0]  ;;  %v1386_v39 = vld [vmem:[%s2629_s0 + $0x40] sm:$0xf0] }
   0xf   :  { %1157 = vmatpush.bf16.msra.mxu1 %v1988_v13  ;;  %v1961_v40 = vld [vmem:[%s2629_s0 + $0xc] sm:$0xf]  ;;  %v1385_v44 = vor.u32 %v1968_v35, %v1384_v34  ;;  %v1393_v45 = vor.u32 %v1969_v37, %v1392_v36  ;;  %v1389_v46 = vor.u32 %v1960_v38, %v1386_v39  ;;  %v2014_v48 = vld [vmem:[%s2627_s1 + $0x130] sm:$0xff]  ;;  %v2012_v56 = vld [vmem:[%s2627_s1 + $0x120] sm:$0xff] }
  0x10   :  { %1171 = vmatpush.bf16.msra.mxu2 %v1996_v14  ;;  %v1394_v41 = vld [vmem:[%s2629_s0 + $0x48] sm:$0xf0]  ;;  %v2022_v49 = vld [vmem:[%s2627_s1 + $0x170] sm:$0xff]  ;;  %v2020_v57 = vld [vmem:[%s2627_s1 + $0x160] sm:$0xff] }
  0x11   :  { %1185 = vmatpush.bf16.msra.mxu3 %v2004_v15  ;;  %v1397_v47 = vor.u32 %v1961_v40, %v1394_v41  ;;  %v2030_v50 = vld [vmem:[%s2627_s1 + $0x1b0] sm:$0xff]  ;;  %v2013_v52 = vld [vmem:[%s2627_s1 + $0x128] sm:$0xff]  ;;  %v2028_v58 = vld [vmem:[%s2627_s1 + $0x1a0] sm:$0xff] }
  0x12   :  { %1144 = vmatpush.bf16.msra.mxu0 %v1979_v16  ;;  %v2038_v51 = vld [vmem:[%s2627_s1 + $0x1f0] sm:$0xff]  ;;  %v2021_v53 = vld [vmem:[%s2627_s1 + $0x168] sm:$0xff]  ;;  %v2036_v59 = vld [vmem:[%s2627_s1 + $0x1e0] sm:$0xff] }
  0x13   :  { %1158 = vmatpush.bf16.msra.mxu1 %v1987_v17  ;;  %v2029_v54 = vld [vmem:[%s2627_s1 + $0x1a8] sm:$0xff]  ;;  %v2011_v60 = vld [vmem:[%s2627_s1 + $0x118] sm:$0xff]  ;;  %v2010_v0 = vld [vmem:[%s2627_s1 + $0x110] sm:$0xff] }
  0x14   :  { %1172 = vmatpush.bf16.msra.mxu2 %v1995_v18  ;;  %v2037_v55 = vld [vmem:[%s2627_s1 + $0x1e8] sm:$0xff]  ;;  %v2019_v61 = vld [vmem:[%s2627_s1 + $0x158] sm:$0xff]  ;;  %v2018_v1 = vld [vmem:[%s2627_s1 + $0x150] sm:$0xff] }
  0x15   :  { %1186 = vmatpush.bf16.msra.mxu3 %v2003_v19  ;;  %v2027_v62 = vld [vmem:[%s2627_s1 + $0x198] sm:$0xff]  ;;  %v2026_v2 = vld [vmem:[%s2627_s1 + $0x190] sm:$0xff]  ;;  %v2009_v4 = vld [vmem:[%s2627_s1 + $0x108] sm:$0xff] }
  0x16   :  { %1145 = vmatpush.bf16.msra.mxu0 %v1978_v20  ;;  %v2035_v63 = vld [vmem:[%s2627_s1 + $0x1d8] sm:$0xff]  ;;  %v2034_v3 = vld [vmem:[%s2627_s1 + $0x1d0] sm:$0xff]  ;;  %v2017_v5 = vld [vmem:[%s2627_s1 + $0x148] sm:$0xff] }
  0x17   :  { %1159 = vmatpush.bf16.msra.mxu1 %v1986_v21  ;;  %v2025_v6 = vld [vmem:[%s2627_s1 + $0x188] sm:$0xff]  ;;  %v2008_v8 = vld [vmem:[%s2627_s1 + $0x100] sm:$0xff]  ;;  %v2047_v12 = vld [vmem:[%s2627_s1 + $0x238] sm:$0xff] }
  0x18   :  { %1173 = vmatpush.bf16.msra.mxu2 %v1994_v22  ;;  %v2033_v7 = vld [vmem:[%s2627_s1 + $0x1c8] sm:$0xff]  ;;  %v2016_v9 = vld [vmem:[%s2627_s1 + $0x140] sm:$0xff]  ;;  %v2055_v13 = vld [vmem:[%s2627_s1 + $0x278] sm:$0xff] }
  0x19   :  { %1187 = vmatpush.bf16.msra.mxu3 %v2002_v23  ;;  %v2024_v10 = vld [vmem:[%s2627_s1 + $0x180] sm:$0xff]  ;;  %v1400_v14 = vld [vmem:[%s2629_s0 + $0x10] sm:$0xf]  ;;  %v1408_v16 = vld [vmem:[%s2629_s0 + $0x18] sm:$0xf] }
  0x1a   :  { %1146 = vmatpush.bf16.msra.mxu0 %v1977_v24  ;;  %v2032_v11 = vld [vmem:[%s2627_s1 + $0x1c0] sm:$0xff]  ;;  %v1970_v15 = vld [vmem:[%s2629_s0 + $0x4c] sm:$0xf0]  ;;  %v1971_v17 = vld [vmem:[%s2629_s0 + $0x54] sm:$0xf0] }
  0x1b   :  { %1160 = vmatpush.bf16.msra.mxu1 %v1985_v25  ;;  %v1962_v18 = vld [vmem:[%s2629_s0 + $0x14] sm:$0xf]  ;;  %v1963_v20 = vld [vmem:[%s2629_s0 + $0x1c] sm:$0xf]  ;;  %v1401_v24 = vor.u32 %v1970_v15, %v1400_v14  ;;  %v1409_v25 = vor.u32 %v1971_v17, %v1408_v16  ;;  %v2061_v34 = vld [vmem:[%s2627_s1 + $0x2a8] sm:$0xff] }
  0x1c   :  { %1174 = vmatpush.bf16.msra.mxu2 %v1993_v26  ;;  %v1402_v19 = vld [vmem:[%s2629_s0 + $0x50] sm:$0xf0]  ;;  %v1410_v21 = vld [vmem:[%s2629_s0 + $0x58] sm:$0xf0]  ;;  %v2069_v35 = vld [vmem:[%s2627_s1 + $0x2e8] sm:$0xff] }
  0x1d   :  { %1188 = vmatpush.bf16.msra.mxu3 %v2001_v27  ;;  %v2063_v22 = vld [vmem:[%s2627_s1 + $0x2b8] sm:$0xff]  ;;  %v1405_v26 = vor.u32 %v1962_v18, %v1402_v19  ;;  %v1413_v27 = vor.u32 %v1963_v20, %v1410_v21  ;;  %v2044_v36 = vld [vmem:[%s2627_s1 + $0x220] sm:$0xff]  ;;  %v2093_v14 = vld [vmem:[%s2627_s1 + $0x3a8] sm:$0xff] }
  0x1e   :  { %1147 = vmatpush.bf16.msra.mxu0 %v1976_v28  ;;  %v2071_v23 = vld [vmem:[%s2627_s1 + $0x2f8] sm:$0xff]  ;;  %v2046_v28 = vld [vmem:[%s2627_s1 + $0x230] sm:$0xff]  ;;  %v2052_v37 = vld [vmem:[%s2627_s1 + $0x260] sm:$0xff] }
  0x1f   :  { %1161 = vmatpush.bf16.msra.mxu1 %v1984_v29  ;;  %v2054_v29 = vld [vmem:[%s2627_s1 + $0x270] sm:$0xff]  ;;  %v2060_v38 = vld [vmem:[%s2627_s1 + $0x2a0] sm:$0xff]  ;;  %v2043_v40 = vld [vmem:[%s2627_s1 + $0x218] sm:$0xff] }
  0x20   :  { %1175 = vmatpush.bf16.msra.mxu2 %v1992_v30  ;;  %v2062_v30 = vld [vmem:[%s2627_s1 + $0x2b0] sm:$0xff]  ;;  %v2068_v39 = vld [vmem:[%s2627_s1 + $0x2e0] sm:$0xff]  ;;  %v2051_v41 = vld [vmem:[%s2627_s1 + $0x258] sm:$0xff] }
  0x21   :  { %1189 = vmatpush.bf16.msra.mxu3 %v2000_v31  ;;  %1148 = vmatmul.bf16.vlgmr.msra.gmra.mxu0 %v1385_v44  ;;  %v2070_v31 = vld [vmem:[%s2627_s1 + $0x2f0] sm:$0xff]  ;;  %v2101_v15 = vld [vmem:[%s2627_s1 + $0x3e8] sm:$0xff]  ;;  %v2076_v16 = vld [vmem:[%s2627_s1 + $0x320] sm:$0xff] }
  0x22   :  { %1196 = vmatpush.bf16.msrb.mxu0 %v2015_v32  ;;  %1162 = vmatmul.bf16.vlgmr.msra.gmra.mxu1 %v1389_v46  ;;  %v2045_v32 = vld [vmem:[%s2627_s1 + $0x228] sm:$0xff]  ;;  %v2042_v44 = vld [vmem:[%s2627_s1 + $0x210] sm:$0xff]  ;;  %v2084_v17 = vld [vmem:[%s2627_s1 + $0x360] sm:$0xff] }
  0x23   :  { %1210 = vmatpush.bf16.msrb.mxu1 %v2023_v33  ;;  %1176 = vmatmul.bf16.vlgmr.msra.gmra.mxu2 %v1393_v45  ;;  %v2053_v33 = vld [vmem:[%s2627_s1 + $0x268] sm:$0xff]  ;;  %v2050_v45 = vld [vmem:[%s2627_s1 + $0x250] sm:$0xff]  ;;  %v2092_v18 = vld [vmem:[%s2627_s1 + $0x3a0] sm:$0xff] }
  0x24   :  { %1224 = vmatpush.bf16.msrb.mxu2 %v2031_v42  ;;  %1190 = vmatmul.bf16.vlgmr.msra.gmra.mxu3 %v1397_v47  ;;  %v2059_v42 = vld [vmem:[%s2627_s1 + $0x298] sm:$0xff]  ;;  %v2058_v46 = vld [vmem:[%s2627_s1 + $0x290] sm:$0xff]  ;;  %v2100_v19 = vld [vmem:[%s2627_s1 + $0x3e0] sm:$0xff] }
  0x25   :  { %1238 = vmatpush.bf16.msrb.mxu3 %v2039_v43  ;;  %v2067_v43 = vld [vmem:[%s2627_s1 + $0x2d8] sm:$0xff]  ;;  %v2066_v47 = vld [vmem:[%s2627_s1 + $0x2d0] sm:$0xff] }
  0x26   :  { %1197 = vmatpush.bf16.msrb.mxu0 %v2014_v48  ;;  %v2041_v48 = vld [vmem:[%s2627_s1 + $0x208] sm:$0xff]  ;;  %v2075_v20 = vld [vmem:[%s2627_s1 + $0x318] sm:$0xff] }
  0x27   :  { %1211 = vmatpush.bf16.msrb.mxu1 %v2022_v49  ;;  %v2049_v49 = vld [vmem:[%s2627_s1 + $0x248] sm:$0xff]  ;;  %v2083_v21 = vld [vmem:[%s2627_s1 + $0x358] sm:$0xff] }
  0x28   :  { %1225 = vmatpush.bf16.msrb.mxu2 %v2030_v50  ;;  %v2057_v50 = vld [vmem:[%s2627_s1 + $0x288] sm:$0xff] }
  0x29   :  { %1239 = vmatpush.bf16.msrb.mxu3 %v2038_v51  ;;  %v2065_v51 = vld [vmem:[%s2627_s1 + $0x2c8] sm:$0xff] }
  0x2a   :  { %1198 = vmatpush.bf16.msrb.mxu0 %v2013_v52  ;;  %v2040_v52 = vld [vmem:[%s2627_s1 + $0x200] sm:$0xff] }
  0x2b   :  { %1212 = vmatpush.bf16.msrb.mxu1 %v2021_v53  ;;  %v2048_v53 = vld [vmem:[%s2627_s1 + $0x240] sm:$0xff] }
  0x2c   :  { %1226 = vmatpush.bf16.msrb.mxu2 %v2029_v54  ;;  %v2056_v54 = vld [vmem:[%s2627_s1 + $0x280] sm:$0xff] }
  0x2d   :  { %1240 = vmatpush.bf16.msrb.mxu3 %v2037_v55  ;;  %v2064_v55 = vld [vmem:[%s2627_s1 + $0x2c0] sm:$0xff] }
  0x2e   :  { %1199 = vmatpush.bf16.msrb.mxu0 %v2012_v56  ;;  %v2079_v56 = vld [vmem:[%s2627_s1 + $0x338] sm:$0xff] }
  0x2f   :  { %1213 = vmatpush.bf16.msrb.mxu1 %v2020_v57  ;;  %v2087_v57 = vld [vmem:[%s2627_s1 + $0x378] sm:$0xff] }
  0x30   :  { %1227 = vmatpush.bf16.msrb.mxu2 %v2028_v58  ;;  %v1416_v58 = vld [vmem:[%s2629_s0 + $0x20] sm:$0xf] }
  0x31   :  { %1241 = vmatpush.bf16.msrb.mxu3 %v2036_v59  ;;  %v1972_v59 = vld [vmem:[%s2629_s0 + $0x5c] sm:$0xf0] }
  0x32   :  { %1200 = vmatpush.bf16.msrb.mxu0 %v2011_v60  ;;  %v1424_v60 = vld [vmem:[%s2629_s0 + $0x28] sm:$0xf] }
  0x33   :  { %1214 = vmatpush.bf16.msrb.mxu1 %v2019_v61  ;;  %v1973_v61 = vld [vmem:[%s2629_s0 + $0x64] sm:$0xf0] }
  0x34   :  { %1228 = vmatpush.bf16.msrb.mxu2 %v2027_v62  ;;  %v1964_v62 = vld [vmem:[%s2629_s0 + $0x24] sm:$0xf] }
  0x35   :  { %1242 = vmatpush.bf16.msrb.mxu3 %v2035_v63  ;;  %v1418_v63 = vld [vmem:[%s2629_s0 + $0x60] sm:$0xf0] }
  0x36   :  { %1201 = vmatpush.bf16.msrb.mxu0 %v2010_v0  ;;  %v1965_v0 = vld [vmem:[%s2629_s0 + $0x2c] sm:$0xf] }
  0x37   :  { %1215 = vmatpush.bf16.msrb.mxu1 %v2018_v1  ;;  %v1426_v1 = vld [vmem:[%s2629_s0 + $0x68] sm:$0xf0] }
  0x38   :  { %1229 = vmatpush.bf16.msrb.mxu2 %v2026_v2  ;;  %v2095_v2 = vld [vmem:[%s2627_s1 + $0x3b8] sm:$0xff] }
  0x39   :  { %1243 = vmatpush.bf16.msrb.mxu3 %v2034_v3  ;;  %v2103_v3 = vld [vmem:[%s2627_s1 + $0x3f8] sm:$0xff] }
  0x3a   :  { %1202 = vmatpush.bf16.msrb.mxu0 %v2009_v4  ;;  %v1417_v4 = vor.u32 %v1972_v59, %v1416_v58 }
  0x3b   :  { %1216 = vmatpush.bf16.msrb.mxu1 %v2017_v5  ;;  %v1425_v5 = vor.u32 %v1973_v61, %v1424_v60 }
  0x3c   :  { %1230 = vmatpush.bf16.msrb.mxu2 %v2025_v6  ;;  %v1421_v6 = vor.u32 %v1964_v62, %v1418_v63 }
  0x3d   :  { %1244 = vmatpush.bf16.msrb.mxu3 %v2033_v7  ;;  %v1429_v7 = vor.u32 %v1965_v0, %v1426_v1 }
  0x3e   :  { %1203 = vmatpush.bf16.msrb.mxu0 %v2008_v8  ;;  %v2078_v8 = vld [vmem:[%s2627_s1 + $0x330] sm:$0xff] }
  0x3f   :  { %1217 = vmatpush.bf16.msrb.mxu1 %v2016_v9  ;;  %v2086_v9 = vld [vmem:[%s2627_s1 + $0x370] sm:$0xff] }
  0x40   :  { %1231 = vmatpush.bf16.msrb.mxu2 %v2024_v10  ;;  %v2094_v10 = vld [vmem:[%s2627_s1 + $0x3b0] sm:$0xff] }
  0x41   :  { %1245 = vmatpush.bf16.msrb.mxu3 %v2032_v11  ;;  %1204 = vmatmul.bf16.vlgmr.msrb.gmra.mxu0 %v1401_v24  ;;  %v2102_v11 = vld [vmem:[%s2627_s1 + $0x3f0] sm:$0xff] }
  0x42   :  { %1252 = vmatpush.bf16.msra.mxu0 %v2047_v12  ;;  %1218 = vmatmul.bf16.vlgmr.msrb.gmra.mxu1 %v1405_v26  ;;  %v2077_v12 = vld [vmem:[%s2627_s1 + $0x328] sm:$0xff]  ;;  %v2074_v24 = vld [vmem:[%s2627_s1 + $0x310] sm:$0xff] }
  0x43   :  { %1266 = vmatpush.bf16.msra.mxu1 %v2055_v13  ;;  %1232 = vmatmul.bf16.vlgmr.msrb.gmra.mxu2 %v1409_v25  ;;  %v2085_v13 = vld [vmem:[%s2627_s1 + $0x368] sm:$0xff]  ;;  %v2082_v25 = vld [vmem:[%s2627_s1 + $0x350] sm:$0xff] }
  0x44   :  { %1280 = vmatpush.bf16.msra.mxu2 %v2063_v22  ;;  %1246 = vmatmul.bf16.vlgmr.msrb.gmra.mxu3 %v1413_v27  ;;  %v2091_v22 = vld [vmem:[%s2627_s1 + $0x398] sm:$0xff]  ;;  %v2090_v26 = vld [vmem:[%s2627_s1 + $0x390] sm:$0xff] }
  0x45   :  { %1294 = vmatpush.bf16.msra.mxu3 %v2071_v23  ;;  %v2099_v23 = vld [vmem:[%s2627_s1 + $0x3d8] sm:$0xff]  ;;  %v2098_v27 = vld [vmem:[%s2627_s1 + $0x3d0] sm:$0xff] }
  0x46   :  { %1253 = vmatpush.bf16.msra.mxu0 %v2046_v28  ;;  %v2073_v28 = vld [vmem:[%s2627_s1 + $0x308] sm:$0xff] }
  0x47   :  { %1267 = vmatpush.bf16.msra.mxu1 %v2054_v29  ;;  %v2081_v29 = vld [vmem:[%s2627_s1 + $0x348] sm:$0xff] }
  0x48   :  { %1281 = vmatpush.bf16.msra.mxu2 %v2062_v30  ;;  %v2089_v30 = vld [vmem:[%s2627_s1 + $0x388] sm:$0xff] }
  0x49   :  { %1295 = vmatpush.bf16.msra.mxu3 %v2070_v31  ;;  %v2097_v31 = vld [vmem:[%s2627_s1 + $0x3c8] sm:$0xff] }
  0x4a   :  { %1254 = vmatpush.bf16.msra.mxu0 %v2045_v32  ;;  %v2072_v32 = vld [vmem:[%s2627_s1 + $0x300] sm:$0xff] }
  0x4b   :  { %1268 = vmatpush.bf16.msra.mxu1 %v2053_v33  ;;  %v2080_v33 = vld [vmem:[%s2627_s1 + $0x340] sm:$0xff] }
  0x4c   :  { %1282 = vmatpush.bf16.msra.mxu2 %v2061_v34  ;;  %v2088_v34 = vld [vmem:[%s2627_s1 + $0x380] sm:$0xff] }
  0x4d   :  { %1296 = vmatpush.bf16.msra.mxu3 %v2069_v35  ;;  %v2096_v35 = vld [vmem:[%s2627_s1 + $0x3c0] sm:$0xff] }
  0x4e   :  { %1255 = vmatpush.bf16.msra.mxu0 %v2044_v36  ;;  %v1432_v36 = vld [vmem:[%s2629_s0 + $0x30] sm:$0xf] }
  0x4f   :  { %1269 = vmatpush.bf16.msra.mxu1 %v2052_v37  ;;  %v1974_v37 = vld [vmem:[%s2629_s0 + $0x6c] sm:$0xf0] }
  0x50   :  { %1283 = vmatpush.bf16.msra.mxu2 %v2060_v38  ;;  %v1966_v38 = vld [vmem:[%s2629_s0 + $0x34] sm:$0xf] }
  0x51   :  { %1297 = vmatpush.bf16.msra.mxu3 %v2068_v39  ;;  %v1434_v39 = vld [vmem:[%s2629_s0 + $0x70] sm:$0xf0] }
  0x52   :  { %1256 = vmatpush.bf16.msra.mxu0 %v2043_v40  ;;  %v1440_v40 = vld [vmem:[%s2629_s0 + $0x38] sm:$0xf] }
  0x53   :  { %1270 = vmatpush.bf16.msra.mxu1 %v2051_v41  ;;  %v1975_v41 = vld [vmem:[%s2629_s0 + $0x74] sm:$0xf0] }
  0x54   :  { %1284 = vmatpush.bf16.msra.mxu2 %v2059_v42  ;;  %v1967_v42 = vld [vmem:[%s2629_s0 + $0x3c] sm:$0xf] }
  0x55   :  { %1298 = vmatpush.bf16.msra.mxu3 %v2067_v43  ;;  %v1442_v43 = vld [vmem:[%s2629_s0 + $0x78] sm:$0xf0] }
  0x56   :  { %1257 = vmatpush.bf16.msra.mxu0 %v2042_v44  ;;  %v1433_v44 = vor.u32 %v1974_v37, %v1432_v36 }
  0x57   :  { %1271 = vmatpush.bf16.msra.mxu1 %v2050_v45  ;;  %v1437_v45 = vor.u32 %v1966_v38, %v1434_v39 }
  0x58   :  { %1285 = vmatpush.bf16.msra.mxu2 %v2058_v46  ;;  %v1441_v46 = vor.u32 %v1975_v41, %v1440_v40 }
  0x59   :  { %1299 = vmatpush.bf16.msra.mxu3 %v2066_v47  ;;  %v1445_v47 = vor.u32 %v1967_v42, %v1442_v43  ;;  %v2106_v43 = vmov 0.0  }
  0x5a   :  { %1258 = vmatpush.bf16.msra.mxu0 %v2041_v48 }
  0x5b   :  { %1272 = vmatpush.bf16.msra.mxu1 %v2049_v49 }
  0x5c   :  { %1286 = vmatpush.bf16.msra.mxu2 %v2057_v50 }
  0x5d   :  { %1300 = vmatpush.bf16.msra.mxu3 %v2065_v51 }
  0x5e   :  { %1259 = vmatpush.bf16.msra.mxu0 %v2040_v52 }
  0x5f   :  { %1273 = vmatpush.bf16.msra.mxu1 %v2048_v53  ;;  %v2105_v53 = vld [vmem:[%s2628_s2] ss:$0 sm:$0xff] }
  0x60   :  { %1287 = vmatpush.bf16.msra.mxu2 %v2056_v54 }
  0x61   :  { %1301 = vmatpush.bf16.msra.mxu3 %v2064_v55  ;;  %1260 = vmatmul.bf16.vlgmr.msra.gmra.mxu0 %v1417_v4 }
  0x62   :  { %1308 = vmatpush.bf16.msrb.mxu0 %v2079_v56  ;;  %1274 = vmatmul.bf16.vlgmr.msra.gmra.mxu1 %v1421_v6 }
  0x63   :  { %1322 = vmatpush.bf16.msrb.mxu1 %v2087_v57  ;;  %1288 = vmatmul.bf16.vlgmr.msra.gmra.mxu2 %v1425_v5 }
  0x64   :  { %1336 = vmatpush.bf16.msrb.mxu2 %v2095_v2  ;;  %1302 = vmatmul.bf16.vlgmr.msra.gmra.mxu3 %v1429_v7 }
  0x65   :  { %1350 = vmatpush.bf16.msrb.mxu3 %v2103_v3 }
  0x66   :  { %1309 = vmatpush.bf16.msrb.mxu0 %v2078_v8 }
  0x67   :  { %1323 = vmatpush.bf16.msrb.mxu1 %v2086_v9 }
  0x68   :  { %1337 = vmatpush.bf16.msrb.mxu2 %v2094_v10 }
  0x69   :  { %1351 = vmatpush.bf16.msrb.mxu3 %v2102_v11 }
  0x6a   :  { %1310 = vmatpush.bf16.msrb.mxu0 %v2077_v12 }
  0x6b   :  { %1324 = vmatpush.bf16.msrb.mxu1 %v2085_v13 }
  0x6c   :  { %1338 = vmatpush.bf16.msrb.mxu2 %v2093_v14 }
  0x6d   :  { %1352 = vmatpush.bf16.msrb.mxu3 %v2101_v15 }
  0x6e   :  { %1311 = vmatpush.bf16.msrb.mxu0 %v2076_v16 }
  0x6f   :  { %1325 = vmatpush.bf16.msrb.mxu1 %v2084_v17 }
  0x70   :  { %1339 = vmatpush.bf16.msrb.mxu2 %v2092_v18 }
  0x71   :  { %1353 = vmatpush.bf16.msrb.mxu3 %v2100_v19 }
  0x72   :  { %1312 = vmatpush.bf16.msrb.mxu0 %v2075_v20 }
  0x73   :  { %1326 = vmatpush.bf16.msrb.mxu1 %v2083_v21 }
  0x74   :  { %1340 = vmatpush.bf16.msrb.mxu2 %v2091_v22 }
  0x75   :  { %1354 = vmatpush.bf16.msrb.mxu3 %v2099_v23 }
  0x76   :  { %1313 = vmatpush.bf16.msrb.mxu0 %v2074_v24 }
  0x77   :  { %1327 = vmatpush.bf16.msrb.mxu1 %v2082_v25 }
  0x78   :  { %1341 = vmatpush.bf16.msrb.mxu2 %v2090_v26 }
  0x79   :  { %1355 = vmatpush.bf16.msrb.mxu3 %v2098_v27 }
  0x7a   :  { %1314 = vmatpush.bf16.msrb.mxu0 %v2073_v28 }
  0x7b   :  { %1328 = vmatpush.bf16.msrb.mxu1 %v2081_v29 }
  0x7c   :  { %1342 = vmatpush.bf16.msrb.mxu2 %v2089_v30 }
  0x7d   :  { %1356 = vmatpush.bf16.msrb.mxu3 %v2097_v31 }
  0x7e   :  { %1315 = vmatpush.bf16.msrb.mxu0 %v2072_v32 }
  0x7f   :  { %1329 = vmatpush.bf16.msrb.mxu1 %v2080_v33 }
  0x80   :  { %1343 = vmatpush.bf16.msrb.mxu2 %v2088_v34 }
  0x81   :  { %1357 = vmatpush.bf16.msrb.mxu3 %v2096_v35  ;;  %1316 = vmatmul.bf16.vlgmr.msrb.gmra.mxu0 %v1433_v44 }
  0x82   :  { %1330 = vmatmul.bf16.vlgmr.msrb.gmra.mxu1 %v1437_v45 }
  0x83   :  { %1344 = vmatmul.bf16.vlgmr.msrb.gmra.mxu2 %v1441_v46 }
  0x84   :  { %1358 = vmatmul.bf16.vlgmr.msrb.gmra.mxu3 %v1445_v47 }
  0x9e   :  { %v1149_v48 = vpop.f32.mrf.mxu0 }
  0x9f   :  { %v1163_v49 = vpop.f32.mrf.mxu1  ;;  %v1150_v55 = vadd.f32 %v2105_v53, %v1149_v48 }
  0xa1   :  { %v1164_v58 = vadd.f32 %v1163_v49, %v1150_v55 }
  0xa6   :  { %v1177_v50 = vpop.f32.mrf.mxu2  ;;  %v1151_v52 = vpop.f32.mrf.mxu0 }
  0xa7   :  { %v1191_v51 = vpop.f32.mrf.mxu3  ;;  %v1165_v54 = vpop.f32.mrf.mxu1  ;;  %v1178_v61 = vadd.f32 %v1177_v50, %v1164_v58  ;;  %v1152_v62 = vadd.f32 %v2105_v53, %v1151_v52 }
  0xa9   :  { %v1192_v1 = vadd.f32 %v1191_v51, %v1178_v61  ;;  %v1166_v2 = vadd.f32 %v1165_v54, %v1152_v62 }
  0xae   :  { %v1179_v56 = vpop.f32.mrf.mxu2 }
  0xaf   :  { %v1193_v57 = vpop.f32.mrf.mxu3  ;;  %v1180_v6 = vadd.f32 %v1179_v56, %v1166_v2 }
  0xb1   :  { %v1194_v10 = vadd.f32 %v1193_v57, %v1180_v6 }
  0xbe   :  { %v1205_v59 = vpop.f32.mrf.mxu0 }
  0xbf   :  { %v1219_v60 = vpop.f32.mrf.mxu1  ;;  %v1206_v4 = vadd.f32 %v1205_v59, %v1192_v1 }
  0xc1   :  { %v1220_v7 = vadd.f32 %v1219_v60, %v1206_v4 }
  0xc6   :  { %v1233_v63 = vpop.f32.mrf.mxu2  ;;  %v1207_v3 = vpop.f32.mrf.mxu0 }
  0xc7   :  { %v1247_v0 = vpop.f32.mrf.mxu3  ;;  %v1221_v5 = vpop.f32.mrf.mxu1  ;;  %v1234_v12 = vadd.f32 %v1233_v63, %v1220_v7  ;;  %v1208_v14 = vadd.f32 %v1207_v3, %v1194_v10 }
  0xc9   :  { %v1248_v15 = vadd.f32 %v1247_v0, %v1234_v12  ;;  %v1222_v18 = vadd.f32 %v1221_v5, %v1208_v14 }
  0xce   :  { %v1235_v8 = vpop.f32.mrf.mxu2 }
  0xcf   :  { %v1249_v9 = vpop.f32.mrf.mxu3  ;;  %v1236_v20 = vadd.f32 %v1235_v8, %v1222_v18 }
  0xd1   :  { %v1250_v24 = vadd.f32 %v1249_v9, %v1236_v20 }
  0xde   :  { %v1261_v11 = vpop.f32.mrf.mxu0 }
  0xdf   :  { %v1275_v13 = vpop.f32.mrf.mxu1  ;;  %v1262_v19 = vadd.f32 %v1261_v11, %v1248_v15 }
  0xe1   :  { %v1276_v22 = vadd.f32 %v1275_v13, %v1262_v19 }
  0xe6   :  { %v1289_v16 = vpop.f32.mrf.mxu2  ;;  %v1263_v21 = vpop.f32.mrf.mxu0 }
  0xe7   :  { %v1303_v17 = vpop.f32.mrf.mxu3  ;;  %v1277_v23 = vpop.f32.mrf.mxu1  ;;  %v1290_v25 = vadd.f32 %v1289_v16, %v1276_v22  ;;  %v1264_v26 = vadd.f32 %v1263_v21, %v1250_v24 }
  0xe9   :  { %v1304_v29 = vadd.f32 %v1303_v17, %v1290_v25  ;;  %v1278_v31 = vadd.f32 %v1277_v23, %v1264_v26 }
  0xee   :  { %v1291_v27 = vpop.f32.mrf.mxu2 }
  0xef   :  { %v1305_v28 = vpop.f32.mrf.mxu3  ;;  %v1292_v34 = vadd.f32 %v1291_v27, %v1278_v31 }
  0xf1   :  { %v1306_v38 = vadd.f32 %v1305_v28, %v1292_v34 }
  0xfe   :  { %v1317_v30 = vpop.f32.mrf.mxu0 }
  0xff   :  { %v1318_v32 = vadd.f32 %v1317_v30, %v1304_v29  ;;  %v1331_v33 = vpop.f32.mrf.mxu1 }
 0x101   :  { %v1332_v35 = vadd.f32 %v1331_v33, %v1318_v32 }
 0x106   :  { %v1345_v36 = vpop.f32.mrf.mxu2  ;;  %v1319_v40 = vpop.f32.mrf.mxu0 }
 0x107   :  { %v1359_v37 = vpop.f32.mrf.mxu3  ;;  %v1346_v39 = vadd.f32 %v1345_v36, %v1332_v35  ;;  %v1320_v42 = vadd.f32 %v1319_v40, %v1306_v38  ;;  %v1333_v45 = vpop.f32.mrf.mxu1 }
 0x109   :  { %v1360_v41 = vadd.f32 %v1359_v37, %v1346_v39  ;;  %v1334_v46 = vadd.f32 %v1333_v45, %v1320_v42 }
 0x10b   :  { %1364 = vst [vmem:[%s2630_s4] sm:$0xff] %v1360_v41  ;;  %vm1366_vm0 = vcmp.gt.f32.partialorder %v1360_v41, 1.0 }
 0x10c   :  { %v1958_v44 = vsel %vm1366_vm0, 1.0, %v2106_v43 }
 0x10d   :  { %1372 = vst [vmem:[%s2631_s3] sm:$0xff] %v1958_v44 }
 0x10e   :  { %v1347_v47 = vpop.f32.mrf.mxu2 }
 0x10f   :  { %v1348_v48 = vadd.f32 %v1347_v47, %v1334_v46  ;;  %v1361_v49 = vpop.f32.mrf.mxu3 }
 0x111   :  { %v1362_v50 = vadd.f32 %v1361_v49, %v1348_v48 }
 0x113   :  { %1365 = vst [vmem:[%s2630_s4 + $0x8] sm:$0xff] %v1362_v50  ;;  %vm1367_vm1 = vcmp.gt.f32.partialorder %v1362_v50, 1.0 }
 0x114   :  { %v1959_v51 = vsel %vm1367_vm1, 1.0, %v2106_v43 }
 0x115   :  { %1373 = vst [vmem:[%s2631_s3 + $0x8] sm:$0xff] %v1959_v51 }

</bundles_post_ra>
